<compile_context>
chip_gen: v5e
topology: v5e:2x2
jax: 0.10.0
libtpu: 0.0.40
codegen_flags: <defaults>
</compile_context>

<pallas_src>
import functools

import numpy as np

import jax
import jax.numpy as jnp
from jax.experimental import pallas as pl
from jax.experimental.pallas import tpu as pltpu

EPS = 1e-5  # torch.nn.InstanceNorm2d default eps


def _roll_lanes(y, k, size):
    """result[:, p] = y[:, (p - k) % size]  (jnp.roll convention, any-sign k)."""
    return pltpu.roll(y, k % size, axis=1)


def _conv3x3_reflect(y, w_ref, masks, W, HWp, matmul_dtype):
    """3x3 conv with reflection padding.

    y:      (Cp, HWp) f32, spatial flattened on the lane axis.
    w_ref:  (9, Cp, Cp) VMEM ref, tap-major (t = ky*3 + kx), already in
            matmul_dtype.
    Returns (Cp, HWp) f32 accumulator.  Each reflection-padded neighborhood
    tap is built with pltpu.roll (XLU) + jnp.where edge masks and consumed
    immediately by an accumulating MXU matmul (no materialized im2col stack).
    """
    is_r0, is_rl, is_c0, is_cl = masks
    up = _roll_lanes(y, W, HWp)       # y[h-1, w]   (valid for h >= 1)
    dn = _roll_lanes(y, -W, HWp)      # y[h+1, w]   (valid for h <= H-2)
    rows = (
        jnp.where(is_r0, dn, up),     # ky=0: row h-1, reflected to row 1 at h==0
        y,                            # ky=1: row h
        jnp.where(is_rl, up, dn),     # ky=2: row h+1, reflected to H-2 at h==H-1
    )
    acc = None
    t = 0
    for r in rows:
        lf = _roll_lanes(r, 1, HWp)   # r[h, w-1]   (valid for w >= 1)
        rt = _roll_lanes(r, -1, HWp)  # r[h, w+1]   (valid for w <= W-2)
        for tap in (jnp.where(is_c0, rt, lf),   # kx=0: col w-1 (reflect 0 -> 1)
                    r,                          # kx=1: col w
                    jnp.where(is_cl, lf, rt)):  # kx=2: col w+1 (reflect W-1 -> W-2)
            part = jnp.dot(w_ref[t], tap.astype(matmul_dtype),
                           preferred_element_type=jnp.float32)
            acc = part if acc is None else acc + part
            t += 1
    return acc


def _instance_norm(y, inv_hw, valid):
    """Per-channel spatial norm (biased variance, no affine), single pass.

    `valid` is None when the lane axis has no padding; otherwise a (1, HWp)
    bool mask selecting the real H*W lanes for the statistics.
    """
    y_stat = y if valid is None else jnp.where(valid, y, 0.0)
    s1 = jnp.sum(y_stat, axis=1, keepdims=True)
    s2 = jnp.sum(y_stat * y_stat, axis=1, keepdims=True)
    mean = s1 * inv_hw
    var = jnp.maximum(s2 * inv_hw - mean * mean, 0.0)
    return (y - mean) * jax.lax.rsqrt(var + EPS)


def residual_block_kernel(x_ref, w1_ref, w2_ref, m_ref, o_ref, *,
                          W, HW, matmul_dtype):
    x = x_ref[0]                       # (Cp, HWp) f32, spatial on the lane axis
    _, HWp = x.shape
    inv_hw = jnp.float32(1.0 / HW)     # statistics over the REAL H*W lanes

    m = m_ref[...]                     # (8, HWp) int32, precomputed on the host
    masks = (m[0:1] != 0,              # row == 0
             m[1:2] != 0,              # row == H-1
             m[2:3] != 0,              # col == 0
             m[3:4] != 0)              # col == W-1
    valid = (m[4:5] != 0) if HWp != HW else None

    # conv1 -> InstanceNorm -> ReLU   (bias dropped: cancelled by the norm)
    y = _conv3x3_reflect(x, w1_ref, masks, W, HWp, matmul_dtype)
    y = jnp.maximum(_instance_norm(y, inv_hw, valid), 0.0)

    # conv2 -> InstanceNorm
    y = _conv3x3_reflect(y, w2_ref, masks, W, HWp, matmul_dtype)
    y = _instance_norm(y, inv_hw, valid)

    # residual add; store is lane-dense (HWp is a multiple of 128)
    o_ref[0] = (x + y).astype(o_ref.dtype)


def _pack_weight(w, c_pad, dtype):
    """(Cout, Cin, 3, 3) PyTorch layout -> (9, Cp, Cp) tap-major blocks."""
    c_out, c_in, kh, kw = w.shape
    wk = jnp.transpose(w, (2, 3, 0, 1))                      # (kh, kw, Cout, Cin)
    wk = jnp.pad(wk, ((0, 0), (0, 0), (0, c_pad - c_out), (0, c_pad - c_in)))
    return wk.reshape(kh * kw, c_pad, c_pad).astype(dtype)


def _make_masks(H, W, HW, HWp):
    """Host-side (8, HWp) int32: rows 0..3 reflection edge masks, row 4 lane-valid."""
    lane = np.arange(HWp)
    row = lane // W
    col = lane % W
    valid = lane < HW
    m = np.zeros((8, HWp), np.int32)
    m[0] = (row == 0) & valid
    m[1] = (row == H - 1) & valid
    m[2] = (col == 0) & valid
    m[3] = (col == W - 1) & valid
    m[4] = valid
    return jnp.asarray(m)


def residual_block(x_nchw, w1, b1, w2, b2, *, matmul_dtype=jnp.bfloat16):
    """x_nchw: (N, C, H, W) f32; w*: (C, C, 3, 3) PyTorch layout; b*: (C,).

    Conv biases are accepted for API parity but unused: a per-channel constant
    added before InstanceNorm(affine=False) is cancelled exactly by the norm.
    """
    del b1, b2
    N, C, H, W = x_nchw.shape
    HW = H * W
    HWp = ((HW + 127) // 128) * 128    # lane-dense stores: pad spatial to 128
    Cp = ((C + 7) // 8) * 8            # sublane-aligned channel count

    # Lane-dense layout: (N, Cp, HWp) with spatial flattened onto lanes.
    x = x_nchw.reshape(N, C, HW)
    if Cp != C or HWp != HW:
        x = jnp.pad(x, ((0, 0), (0, Cp - C), (0, HWp - HW)))

    w1k = _pack_weight(w1, Cp, matmul_dtype)
    w2k = _pack_weight(w2, Cp, matmul_dtype)
    masks = _make_masks(H, W, HW, HWp)

    kernel = functools.partial(residual_block_kernel, W=W, HW=HW,
                               matmul_dtype=matmul_dtype)

    def build_and_run(const_kw):
        return pl.pallas_call(
            kernel,
            out_shape=jax.ShapeDtypeStruct((N, Cp, HWp), x.dtype),
            grid_spec=pltpu.PrefetchScalarGridSpec(
                num_scalar_prefetch=0,
                grid=(N,),                       # parallel over batch
                in_specs=[
                    pl.BlockSpec((1, Cp, HWp), lambda n: (n, 0, 0)),
                    pl.BlockSpec((9, Cp, Cp), lambda n: (0, 0, 0), **const_kw),
                    pl.BlockSpec((9, Cp, Cp), lambda n: (0, 0, 0), **const_kw),
                    pl.BlockSpec((8, HWp), lambda n: (0, 0), **const_kw),
                ],
                out_specs=pl.BlockSpec((1, Cp, HWp), lambda n: (n, 0, 0)),
            ),
            compiler_params=pltpu.CompilerParams(
                dimension_semantics=("parallel",),
                # Above the 16/32 MiB scoped defaults (v5e/v6e/v7x), below
                # v7x's 64 MiB physical VMEM.
                vmem_limit_bytes=48 * 1024 * 1024,
            ),
        )(x, w1k, w2k, masks)

    try:
        # Constant-index_map inputs don't need double buffers.
        out = build_and_run(dict(pipeline_mode=pl.Buffered(1)))
    except Exception:
        # pipeline_mode / Buffered not supported on this jax version: fall back
        # to default (double-buffered) pipelining for the constants.
        out = build_and_run({})

    return out[:, :C, :HW].reshape(N, C, H, W)


def _ref_forward(x, w1, b1, w2, b2, conv_dtype=jnp.float32):
    """Pure-JAX reference of the PyTorch module (NCHW), biases included.

    `conv_dtype` lets us quantize conv inputs/weights to bf16 at the same
    points as the kernel's bf16 MXU path (accumulation stays f32).
    """
    def pad(z):
        return jnp.pad(z, ((0, 0), (0, 0), (1, 1), (1, 1)), mode="reflect")

    def conv(z, w, b):
        y = jax.lax.conv_general_dilated(
            pad(z).astype(conv_dtype), w.astype(conv_dtype), (1, 1), "VALID",
            dimension_numbers=("NCHW", "OIHW", "NCHW"),
            preferred_element_type=jnp.float32,
            precision=jax.lax.Precision.HIGHEST)
        return y + b[None, :, None, None]

    def inorm(z):
        m = z.mean(axis=(2, 3), keepdims=True)
        v = ((z - m) ** 2).mean(axis=(2, 3), keepdims=True)
        return (z - m) * jax.lax.rsqrt(v + EPS)

    y = jnp.maximum(inorm(conv(x, w1, b1)), 0.0)
    y = inorm(conv(y, w2, b2))
    return x + y


if __name__ == "__main__":
    N, C, H, W = 2, 4, 16, 16
    key = jax.random.PRNGKey(0)
    kx, kw1, kw2, kb1, kb2 = jax.random.split(key, 5)

    x = jax.random.normal(kx, (N, C, H, W), jnp.float32)

    # deterministic init matching Conv2d param shapes (Cout, Cin, 3, 3)
    fan_in = C * 3 * 3
    bound = 1.0 / (fan_in ** 0.5)
    w1 = jax.random.uniform(kw1, (C, C, 3, 3), jnp.float32, -bound, bound)
    w2 = jax.random.uniform(kw2, (C, C, 3, 3), jnp.float32, -bound, bound)
    b1 = jax.random.uniform(kb1, (C,), jnp.float32, -bound, bound)
    b2 = jax.random.uniform(kb2, (C,), jnp.float32, -bound, bound)

    # 1) f32 MXU path vs f32 reference (tight tolerance).
    out = residual_block(x, w1, b1, w2, b2, matmul_dtype=jnp.float32)
    jax.block_until_ready(out)
    ref = _ref_forward(x, w1, b1, w2, b2)
    assert out.shape == x.shape
    err = float(jnp.max(jnp.abs(out - ref)))
    assert err < 1e-3, f"f32 path mismatch vs reference: {err}"

    # 2) H*W that is NOT a multiple of 128 lanes: exercises lane padding +
    #    masked InstanceNorm statistics.
    x2 = jax.random.normal(jax.random.PRNGKey(1), (N, C, 10, 12), jnp.float32)
    out2 = residual_block(x2, w1, b1, w2, b2, matmul_dtype=jnp.float32)
    jax.block_until_ready(out2)
    ref2 = _ref_forward(x2, w1, b1, w2, b2)
    err2 = float(jnp.max(jnp.abs(out2 - ref2)))
    assert err2 < 1e-3, f"padded-HW path mismatch vs reference: {err2}"

    # 3) default bf16 MXU path vs a reference quantized to bf16 at the same
    #    points (isolates bf16 quantization from kernel math).
    out_bf = residual_block(x, w1, b1, w2, b2)
    jax.block_until_ready(out_bf)
    ref_bf = _ref_forward(x, w1, b1, w2, b2, conv_dtype=jnp.bfloat16)
    err_bf = float(jnp.max(jnp.abs(out_bf - ref_bf)))
    assert err_bf < 2e-2, f"bf16 path mismatch vs bf16 reference: {err_bf}"

    print("KERNEL_OK")
</pallas_src>

<mosaic_0001>
module attributes {stable_mosaic.version = 11 : i64} {
  func.func @residual_block_kernel(%arg0: i32, %arg1: memref<1x8x256xf32, #tpu.memory_space<vmem>>, %arg2: memref<9x8x8xf32, #tpu.memory_space<vmem>>, %arg3: memref<9x8x8xf32, #tpu.memory_space<vmem>>, %arg4: memref<8x256xi32, #tpu.memory_space<vmem>>, %arg5: memref<1x8x256xf32, #tpu.memory_space<vmem>>) attributes {dimension_semantics = [#tpu.dimension_semantics<parallel>], iteration_bounds = array<i64: 2>, scalar_prefetch = 0 : i64, scratch_operands = 0 : i64, tpu.core_type = #tpu.core_type<tc>, window_params = [{transform_indices = @transform_0, window_bounds = array<i64: 1, 8, 256>}, {pipeline_mode = #tpu.pipeline_mode<synchronous>, transform_indices = @transform_1, window_bounds = array<i64: 9, 8, 8>}, {pipeline_mode = #tpu.pipeline_mode<synchronous>, transform_indices = @transform_2, window_bounds = array<i64: 9, 8, 8>}, {pipeline_mode = #tpu.pipeline_mode<synchronous>, transform_indices = @transform_3, window_bounds = array<i64: 8, 256>}, {transform_indices = @transform_4, window_bounds = array<i64: 1, 8, 256>}]} {
    %c0 = arith.constant 0 : index
    %c0_0 = arith.constant 0 : index
    %c0_1 = arith.constant 0 : index
    %0 = vector.load %arg1[%c0, %c0_0, %c0_1] : memref<1x8x256xf32, #tpu.memory_space<vmem>>, vector<1x8x256xf32>
    %1 = vector.shape_cast %0 : vector<1x8x256xf32> to vector<8x256xf32>
    %c0_2 = arith.constant 0 : index
    %c0_3 = arith.constant 0 : index
    %2 = vector.load %arg4[%c0_2, %c0_3] : memref<8x256xi32, #tpu.memory_space<vmem>>, vector<8x256xi32>
    %3 = vector.extract_strided_slice %2 {offsets = [0, 0], sizes = [1, 256], strides = [1, 1]} : vector<8x256xi32> to vector<1x256xi32>
    %c0_i32 = arith.constant 0 : i32
    %4 = vector.broadcast %c0_i32 : i32 to vector<1x256xi32>
    %5 = arith.cmpi ne, %3, %4 : vector<1x256xi32>
    %6 = vector.extract_strided_slice %2 {offsets = [1, 0], sizes = [1, 256], strides = [1, 1]} : vector<8x256xi32> to vector<1x256xi32>
    %c0_i32_4 = arith.constant 0 : i32
    %7 = vector.broadcast %c0_i32_4 : i32 to vector<1x256xi32>
    %8 = arith.cmpi ne, %6, %7 : vector<1x256xi32>
    %9 = vector.extract_strided_slice %2 {offsets = [2, 0], sizes = [1, 256], strides = [1, 1]} : vector<8x256xi32> to vector<1x256xi32>
    %c0_i32_5 = arith.constant 0 : i32
    %10 = vector.broadcast %c0_i32_5 : i32 to vector<1x256xi32>
    %11 = arith.cmpi ne, %9, %10 : vector<1x256xi32>
    %12 = vector.extract_strided_slice %2 {offsets = [3, 0], sizes = [1, 256], strides = [1, 1]} : vector<8x256xi32> to vector<1x256xi32>
    %c0_i32_6 = arith.constant 0 : i32
    %13 = vector.broadcast %c0_i32_6 : i32 to vector<1x256xi32>
    %14 = arith.cmpi ne, %12, %13 : vector<1x256xi32>
    %c16_i32 = arith.constant 16 : i32
    %15 = tpu.dynamic_rotate %1 by %c16_i32 dim 1 : vector<8x256xf32>, i32 -> vector<8x256xf32>
    %c240_i32 = arith.constant 240 : i32
    %16 = tpu.dynamic_rotate %1 by %c240_i32 dim 1 : vector<8x256xf32>, i32 -> vector<8x256xf32>
    %17 = vector.shape_cast %5 : vector<1x256xi1> to vector<1x256xi1>
    %18 = vector.broadcast %17 : vector<1x256xi1> to vector<8x256xi1>
    %19 = arith.select %18, %16, %15 : vector<8x256xi1>, vector<8x256xf32>
    %20 = vector.shape_cast %8 : vector<1x256xi1> to vector<1x256xi1>
    %21 = vector.broadcast %20 : vector<1x256xi1> to vector<8x256xi1>
    %22 = arith.select %21, %15, %16 : vector<8x256xi1>, vector<8x256xf32>
    %c1_i32 = arith.constant 1 : i32
    %23 = tpu.dynamic_rotate %19 by %c1_i32 dim 1 : vector<8x256xf32>, i32 -> vector<8x256xf32>
    %c255_i32 = arith.constant 255 : i32
    %24 = tpu.dynamic_rotate %19 by %c255_i32 dim 1 : vector<8x256xf32>, i32 -> vector<8x256xf32>
    %25 = vector.shape_cast %11 : vector<1x256xi1> to vector<1x256xi1>
    %26 = vector.broadcast %25 : vector<1x256xi1> to vector<8x256xi1>
    %27 = arith.select %26, %24, %23 : vector<8x256xi1>, vector<8x256xf32>
    %28 = vector.shape_cast %14 : vector<1x256xi1> to vector<1x256xi1>
    %29 = vector.broadcast %28 : vector<1x256xi1> to vector<8x256xi1>
    %30 = arith.select %29, %23, %24 : vector<8x256xi1>, vector<8x256xf32>
    %c0_7 = arith.constant 0 : index
    %c0_8 = arith.constant 0 : index
    %c0_9 = arith.constant 0 : index
    %31 = vector.load %arg2[%c0_7, %c0_8, %c0_9] : memref<9x8x8xf32, #tpu.memory_space<vmem>>, vector<1x8x8xf32>
    %32 = vector.shape_cast %31 : vector<1x8x8xf32> to vector<8x8xf32>
    %cst = arith.constant dense<0.000000e+00> : vector<8x256xf32>
    %33 = tpu.matmul %32, %27, %cst {dimension_numbers = #tpu.dot_dimension_numbers<[1], [0], [0], [1], [0, 0, 1, 1], [], []>} : vector<8x8xf32>, vector<8x256xf32>, vector<8x256xf32> -> vector<8x256xf32>
    %c1 = arith.constant 1 : index
    %c0_10 = arith.constant 0 : index
    %c0_11 = arith.constant 0 : index
    %34 = vector.load %arg2[%c1, %c0_10, %c0_11] : memref<9x8x8xf32, #tpu.memory_space<vmem>>, vector<1x8x8xf32>
    %35 = vector.shape_cast %34 : vector<1x8x8xf32> to vector<8x8xf32>
    %cst_12 = arith.constant dense<0.000000e+00> : vector<8x256xf32>
    %36 = tpu.matmul %35, %19, %cst_12 {dimension_numbers = #tpu.dot_dimension_numbers<[1], [0], [0], [1], [0, 0, 1, 1], [], []>} : vector<8x8xf32>, vector<8x256xf32>, vector<8x256xf32> -> vector<8x256xf32>
    %37 = arith.addf %33, %36 : vector<8x256xf32>
    %c2 = arith.constant 2 : index
    %c0_13 = arith.constant 0 : index
    %c0_14 = arith.constant 0 : index
    %38 = vector.load %arg2[%c2, %c0_13, %c0_14] : memref<9x8x8xf32, #tpu.memory_space<vmem>>, vector<1x8x8xf32>
    %39 = vector.shape_cast %38 : vector<1x8x8xf32> to vector<8x8xf32>
    %cst_15 = arith.constant dense<0.000000e+00> : vector<8x256xf32>
    %40 = tpu.matmul %39, %30, %cst_15 {dimension_numbers = #tpu.dot_dimension_numbers<[1], [0], [0], [1], [0, 0, 1, 1], [], []>} : vector<8x8xf32>, vector<8x256xf32>, vector<8x256xf32> -> vector<8x256xf32>
    %41 = arith.addf %37, %40 : vector<8x256xf32>
    %c1_i32_16 = arith.constant 1 : i32
    %42 = tpu.dynamic_rotate %1 by %c1_i32_16 dim 1 : vector<8x256xf32>, i32 -> vector<8x256xf32>
    %c255_i32_17 = arith.constant 255 : i32
    %43 = tpu.dynamic_rotate %1 by %c255_i32_17 dim 1 : vector<8x256xf32>, i32 -> vector<8x256xf32>
    %44 = vector.shape_cast %11 : vector<1x256xi1> to vector<1x256xi1>
    %45 = vector.broadcast %44 : vector<1x256xi1> to vector<8x256xi1>
    %46 = arith.select %45, %43, %42 : vector<8x256xi1>, vector<8x256xf32>
    %47 = vector.shape_cast %14 : vector<1x256xi1> to vector<1x256xi1>
    %48 = vector.broadcast %47 : vector<1x256xi1> to vector<8x256xi1>
    %49 = arith.select %48, %42, %43 : vector<8x256xi1>, vector<8x256xf32>
    %c3 = arith.constant 3 : index
    %c0_18 = arith.constant 0 : index
    %c0_19 = arith.constant 0 : index
    %50 = vector.load %arg2[%c3, %c0_18, %c0_19] : memref<9x8x8xf32, #tpu.memory_space<vmem>>, vector<1x8x8xf32>
    %51 = vector.shape_cast %50 : vector<1x8x8xf32> to vector<8x8xf32>
    %cst_20 = arith.constant dense<0.000000e+00> : vector<8x256xf32>
    %52 = tpu.matmul %51, %46, %cst_20 {dimension_numbers = #tpu.dot_dimension_numbers<[1], [0], [0], [1], [0, 0, 1, 1], [], []>} : vector<8x8xf32>, vector<8x256xf32>, vector<8x256xf32> -> vector<8x256xf32>
    %53 = arith.addf %41, %52 : vector<8x256xf32>
    %c4 = arith.constant 4 : index
    %c0_21 = arith.constant 0 : index
    %c0_22 = arith.constant 0 : index
    %54 = vector.load %arg2[%c4, %c0_21, %c0_22] : memref<9x8x8xf32, #tpu.memory_space<vmem>>, vector<1x8x8xf32>
    %55 = vector.shape_cast %54 : vector<1x8x8xf32> to vector<8x8xf32>
    %cst_23 = arith.constant dense<0.000000e+00> : vector<8x256xf32>
    %56 = tpu.matmul %55, %1, %cst_23 {dimension_numbers = #tpu.dot_dimension_numbers<[1], [0], [0], [1], [0, 0, 1, 1], [], []>} : vector<8x8xf32>, vector<8x256xf32>, vector<8x256xf32> -> vector<8x256xf32>
    %57 = arith.addf %53, %56 : vector<8x256xf32>
    %c5 = arith.constant 5 : index
    %c0_24 = arith.constant 0 : index
    %c0_25 = arith.constant 0 : index
    %58 = vector.load %arg2[%c5, %c0_24, %c0_25] : memref<9x8x8xf32, #tpu.memory_space<vmem>>, vector<1x8x8xf32>
    %59 = vector.shape_cast %58 : vector<1x8x8xf32> to vector<8x8xf32>
    %cst_26 = arith.constant dense<0.000000e+00> : vector<8x256xf32>
    %60 = tpu.matmul %59, %49, %cst_26 {dimension_numbers = #tpu.dot_dimension_numbers<[1], [0], [0], [1], [0, 0, 1, 1], [], []>} : vector<8x8xf32>, vector<8x256xf32>, vector<8x256xf32> -> vector<8x256xf32>
    %61 = arith.addf %57, %60 : vector<8x256xf32>
    %c1_i32_27 = arith.constant 1 : i32
    %62 = tpu.dynamic_rotate %22 by %c1_i32_27 dim 1 : vector<8x256xf32>, i32 -> vector<8x256xf32>
    %c255_i32_28 = arith.constant 255 : i32
    %63 = tpu.dynamic_rotate %22 by %c255_i32_28 dim 1 : vector<8x256xf32>, i32 -> vector<8x256xf32>
    %64 = vector.shape_cast %11 : vector<1x256xi1> to vector<1x256xi1>
    %65 = vector.broadcast %64 : vector<1x256xi1> to vector<8x256xi1>
    %66 = arith.select %65, %63, %62 : vector<8x256xi1>, vector<8x256xf32>
    %67 = vector.shape_cast %14 : vector<1x256xi1> to vector<1x256xi1>
    %68 = vector.broadcast %67 : vector<1x256xi1> to vector<8x256xi1>
    %69 = arith.select %68, %62, %63 : vector<8x256xi1>, vector<8x256xf32>
    %c6 = arith.constant 6 : index
    %c0_29 = arith.constant 0 : index
    %c0_30 = arith.constant 0 : index
    %70 = vector.load %arg2[%c6, %c0_29, %c0_30] : memref<9x8x8xf32, #tpu.memory_space<vmem>>, vector<1x8x8xf32>
    %71 = vector.shape_cast %70 : vector<1x8x8xf32> to vector<8x8xf32>
    %cst_31 = arith.constant dense<0.000000e+00> : vector<8x256xf32>
    %72 = tpu.matmul %71, %66, %cst_31 {dimension_numbers = #tpu.dot_dimension_numbers<[1], [0], [0], [1], [0, 0, 1, 1], [], []>} : vector<8x8xf32>, vector<8x256xf32>, vector<8x256xf32> -> vector<8x256xf32>
    %73 = arith.addf %61, %72 : vector<8x256xf32>
    %c7 = arith.constant 7 : index
    %c0_32 = arith.constant 0 : index
    %c0_33 = arith.constant 0 : index
    %74 = vector.load %arg2[%c7, %c0_32, %c0_33] : memref<9x8x8xf32, #tpu.memory_space<vmem>>, vector<1x8x8xf32>
    %75 = vector.shape_cast %74 : vector<1x8x8xf32> to vector<8x8xf32>
    %cst_34 = arith.constant dense<0.000000e+00> : vector<8x256xf32>
    %76 = tpu.matmul %75, %22, %cst_34 {dimension_numbers = #tpu.dot_dimension_numbers<[1], [0], [0], [1], [0, 0, 1, 1], [], []>} : vector<8x8xf32>, vector<8x256xf32>, vector<8x256xf32> -> vector<8x256xf32>
    %77 = arith.addf %73, %76 : vector<8x256xf32>
    %c8 = arith.constant 8 : index
    %c0_35 = arith.constant 0 : index
    %c0_36 = arith.constant 0 : index
    %78 = vector.load %arg2[%c8, %c0_35, %c0_36] : memref<9x8x8xf32, #tpu.memory_space<vmem>>, vector<1x8x8xf32>
    %79 = vector.shape_cast %78 : vector<1x8x8xf32> to vector<8x8xf32>
    %cst_37 = arith.constant dense<0.000000e+00> : vector<8x256xf32>
    %80 = tpu.matmul %79, %69, %cst_37 {dimension_numbers = #tpu.dot_dimension_numbers<[1], [0], [0], [1], [0, 0, 1, 1], [], []>} : vector<8x8xf32>, vector<8x256xf32>, vector<8x256xf32> -> vector<8x256xf32>
    %81 = arith.addf %77, %80 : vector<8x256xf32>
    %cst_38 = arith.constant dense<0.000000e+00> : vector<8xf32>
    %82 = vector.multi_reduction <add>, %81, %cst_38 [1] : vector<8x256xf32> to vector<8xf32>
    %83 = vector.shape_cast %82 : vector<8xf32> to vector<8x1xf32>
    %84 = arith.mulf %81, %81 : vector<8x256xf32>
    %cst_39 = arith.constant dense<0.000000e+00> : vector<8xf32>
    %85 = vector.multi_reduction <add>, %84, %cst_39 [1] : vector<8x256xf32> to vector<8xf32>
    %86 = vector.shape_cast %85 : vector<8xf32> to vector<8x1xf32>
    %cst_40 = arith.constant 3.906250e-03 : f32
    %87 = vector.broadcast %cst_40 : f32 to vector<8x1xf32>
    %88 = arith.mulf %83, %87 : vector<8x1xf32>
    %cst_41 = arith.constant 3.906250e-03 : f32
    %89 = vector.broadcast %cst_41 : f32 to vector<8x1xf32>
    %90 = arith.mulf %86, %89 : vector<8x1xf32>
    %91 = arith.mulf %88, %88 : vector<8x1xf32>
    %92 = arith.subf %90, %91 : vector<8x1xf32>
    %cst_42 = arith.constant 0.000000e+00 : f32
    %93 = vector.broadcast %cst_42 : f32 to vector<8x1xf32>
    %94 = arith.maximumf %92, %93 : vector<8x1xf32>
    %95 = vector.broadcast %88 : vector<8x1xf32> to vector<8x256xf32>
    %96 = arith.subf %81, %95 : vector<8x256xf32>
    %cst_43 = arith.constant 9.99999974E-6 : f32
    %97 = vector.broadcast %cst_43 : f32 to vector<8x1xf32>
    %98 = arith.addf %94, %97 : vector<8x1xf32>
    %99 = math.rsqrt %98 : vector<8x1xf32>
    %100 = vector.broadcast %99 : vector<8x1xf32> to vector<8x256xf32>
    %101 = arith.mulf %96, %100 : vector<8x256xf32>
    %cst_44 = arith.constant 0.000000e+00 : f32
    %102 = vector.broadcast %cst_44 : f32 to vector<8x256xf32>
    %103 = arith.maximumf %101, %102 : vector<8x256xf32>
    %c16_i32_45 = arith.constant 16 : i32
    %104 = tpu.dynamic_rotate %103 by %c16_i32_45 dim 1 : vector<8x256xf32>, i32 -> vector<8x256xf32>
    %c240_i32_46 = arith.constant 240 : i32
    %105 = tpu.dynamic_rotate %103 by %c240_i32_46 dim 1 : vector<8x256xf32>, i32 -> vector<8x256xf32>
    %106 = vector.shape_cast %5 : vector<1x256xi1> to vector<1x256xi1>
    %107 = vector.broadcast %106 : vector<1x256xi1> to vector<8x256xi1>
    %108 = arith.select %107, %105, %104 : vector<8x256xi1>, vector<8x256xf32>
    %109 = vector.shape_cast %8 : vector<1x256xi1> to vector<1x256xi1>
    %110 = vector.broadcast %109 : vector<1x256xi1> to vector<8x256xi1>
    %111 = arith.select %110, %104, %105 : vector<8x256xi1>, vector<8x256xf32>
    %c1_i32_47 = arith.constant 1 : i32
    %112 = tpu.dynamic_rotate %108 by %c1_i32_47 dim 1 : vector<8x256xf32>, i32 -> vector<8x256xf32>
    %c255_i32_48 = arith.constant 255 : i32
    %113 = tpu.dynamic_rotate %108 by %c255_i32_48 dim 1 : vector<8x256xf32>, i32 -> vector<8x256xf32>
    %114 = vector.shape_cast %11 : vector<1x256xi1> to vector<1x256xi1>
    %115 = vector.broadcast %114 : vector<1x256xi1> to vector<8x256xi1>
    %116 = arith.select %115, %113, %112 : vector<8x256xi1>, vector<8x256xf32>
    %117 = vector.shape_cast %14 : vector<1x256xi1> to vector<1x256xi1>
    %118 = vector.broadcast %117 : vector<1x256xi1> to vector<8x256xi1>
    %119 = arith.select %118, %112, %113 : vector<8x256xi1>, vector<8x256xf32>
    %c0_49 = arith.constant 0 : index
    %c0_50 = arith.constant 0 : index
    %c0_51 = arith.constant 0 : index
    %120 = vector.load %arg3[%c0_49, %c0_50, %c0_51] : memref<9x8x8xf32, #tpu.memory_space<vmem>>, vector<1x8x8xf32>
    %121 = vector.shape_cast %120 : vector<1x8x8xf32> to vector<8x8xf32>
    %cst_52 = arith.constant dense<0.000000e+00> : vector<8x256xf32>
    %122 = tpu.matmul %121, %116, %cst_52 {dimension_numbers = #tpu.dot_dimension_numbers<[1], [0], [0], [1], [0, 0, 1, 1], [], []>} : vector<8x8xf32>, vector<8x256xf32>, vector<8x256xf32> -> vector<8x256xf32>
    %c1_53 = arith.constant 1 : index
    %c0_54 = arith.constant 0 : index
    %c0_55 = arith.constant 0 : index
    %123 = vector.load %arg3[%c1_53, %c0_54, %c0_55] : memref<9x8x8xf32, #tpu.memory_space<vmem>>, vector<1x8x8xf32>
    %124 = vector.shape_cast %123 : vector<1x8x8xf32> to vector<8x8xf32>
    %cst_56 = arith.constant dense<0.000000e+00> : vector<8x256xf32>
    %125 = tpu.matmul %124, %108, %cst_56 {dimension_numbers = #tpu.dot_dimension_numbers<[1], [0], [0], [1], [0, 0, 1, 1], [], []>} : vector<8x8xf32>, vector<8x256xf32>, vector<8x256xf32> -> vector<8x256xf32>
    %126 = arith.addf %122, %125 : vector<8x256xf32>
    %c2_57 = arith.constant 2 : index
    %c0_58 = arith.constant 0 : index
    %c0_59 = arith.constant 0 : index
    %127 = vector.load %arg3[%c2_57, %c0_58, %c0_59] : memref<9x8x8xf32, #tpu.memory_space<vmem>>, vector<1x8x8xf32>
    %128 = vector.shape_cast %127 : vector<1x8x8xf32> to vector<8x8xf32>
    %cst_60 = arith.constant dense<0.000000e+00> : vector<8x256xf32>
    %129 = tpu.matmul %128, %119, %cst_60 {dimension_numbers = #tpu.dot_dimension_numbers<[1], [0], [0], [1], [0, 0, 1, 1], [], []>} : vector<8x8xf32>, vector<8x256xf32>, vector<8x256xf32> -> vector<8x256xf32>
    %130 = arith.addf %126, %129 : vector<8x256xf32>
    %c1_i32_61 = arith.constant 1 : i32
    %131 = tpu.dynamic_rotate %103 by %c1_i32_61 dim 1 : vector<8x256xf32>, i32 -> vector<8x256xf32>
    %c255_i32_62 = arith.constant 255 : i32
    %132 = tpu.dynamic_rotate %103 by %c255_i32_62 dim 1 : vector<8x256xf32>, i32 -> vector<8x256xf32>
    %133 = vector.shape_cast %11 : vector<1x256xi1> to vector<1x256xi1>
    %134 = vector.broadcast %133 : vector<1x256xi1> to vector<8x256xi1>
    %135 = arith.select %134, %132, %131 : vector<8x256xi1>, vector<8x256xf32>
    %136 = vector.shape_cast %14 : vector<1x256xi1> to vector<1x256xi1>
    %137 = vector.broadcast %136 : vector<1x256xi1> to vector<8x256xi1>
    %138 = arith.select %137, %131, %132 : vector<8x256xi1>, vector<8x256xf32>
    %c3_63 = arith.constant 3 : index
    %c0_64 = arith.constant 0 : index
    %c0_65 = arith.constant 0 : index
    %139 = vector.load %arg3[%c3_63, %c0_64, %c0_65] : memref<9x8x8xf32, #tpu.memory_space<vmem>>, vector<1x8x8xf32>
    %140 = vector.shape_cast %139 : vector<1x8x8xf32> to vector<8x8xf32>
    %cst_66 = arith.constant dense<0.000000e+00> : vector<8x256xf32>
    %141 = tpu.matmul %140, %135, %cst_66 {dimension_numbers = #tpu.dot_dimension_numbers<[1], [0], [0], [1], [0, 0, 1, 1], [], []>} : vector<8x8xf32>, vector<8x256xf32>, vector<8x256xf32> -> vector<8x256xf32>
    %142 = arith.addf %130, %141 : vector<8x256xf32>
    %c4_67 = arith.constant 4 : index
    %c0_68 = arith.constant 0 : index
    %c0_69 = arith.constant 0 : index
    %143 = vector.load %arg3[%c4_67, %c0_68, %c0_69] : memref<9x8x8xf32, #tpu.memory_space<vmem>>, vector<1x8x8xf32>
    %144 = vector.shape_cast %143 : vector<1x8x8xf32> to vector<8x8xf32>
    %cst_70 = arith.constant dense<0.000000e+00> : vector<8x256xf32>
    %145 = tpu.matmul %144, %103, %cst_70 {dimension_numbers = #tpu.dot_dimension_numbers<[1], [0], [0], [1], [0, 0, 1, 1], [], []>} : vector<8x8xf32>, vector<8x256xf32>, vector<8x256xf32> -> vector<8x256xf32>
    %146 = arith.addf %142, %145 : vector<8x256xf32>
    %c5_71 = arith.constant 5 : index
    %c0_72 = arith.constant 0 : index
    %c0_73 = arith.constant 0 : index
    %147 = vector.load %arg3[%c5_71, %c0_72, %c0_73] : memref<9x8x8xf32, #tpu.memory_space<vmem>>, vector<1x8x8xf32>
    %148 = vector.shape_cast %147 : vector<1x8x8xf32> to vector<8x8xf32>
    %cst_74 = arith.constant dense<0.000000e+00> : vector<8x256xf32>
    %149 = tpu.matmul %148, %138, %cst_74 {dimension_numbers = #tpu.dot_dimension_numbers<[1], [0], [0], [1], [0, 0, 1, 1], [], []>} : vector<8x8xf32>, vector<8x256xf32>, vector<8x256xf32> -> vector<8x256xf32>
    %150 = arith.addf %146, %149 : vector<8x256xf32>
    %c1_i32_75 = arith.constant 1 : i32
    %151 = tpu.dynamic_rotate %111 by %c1_i32_75 dim 1 : vector<8x256xf32>, i32 -> vector<8x256xf32>
    %c255_i32_76 = arith.constant 255 : i32
    %152 = tpu.dynamic_rotate %111 by %c255_i32_76 dim 1 : vector<8x256xf32>, i32 -> vector<8x256xf32>
    %153 = vector.shape_cast %11 : vector<1x256xi1> to vector<1x256xi1>
    %154 = vector.broadcast %153 : vector<1x256xi1> to vector<8x256xi1>
    %155 = arith.select %154, %152, %151 : vector<8x256xi1>, vector<8x256xf32>
    %156 = vector.shape_cast %14 : vector<1x256xi1> to vector<1x256xi1>
    %157 = vector.broadcast %156 : vector<1x256xi1> to vector<8x256xi1>
    %158 = arith.select %157, %151, %152 : vector<8x256xi1>, vector<8x256xf32>
    %c6_77 = arith.constant 6 : index
    %c0_78 = arith.constant 0 : index
    %c0_79 = arith.constant 0 : index
    %159 = vector.load %arg3[%c6_77, %c0_78, %c0_79] : memref<9x8x8xf32, #tpu.memory_space<vmem>>, vector<1x8x8xf32>
    %160 = vector.shape_cast %159 : vector<1x8x8xf32> to vector<8x8xf32>
    %cst_80 = arith.constant dense<0.000000e+00> : vector<8x256xf32>
    %161 = tpu.matmul %160, %155, %cst_80 {dimension_numbers = #tpu.dot_dimension_numbers<[1], [0], [0], [1], [0, 0, 1, 1], [], []>} : vector<8x8xf32>, vector<8x256xf32>, vector<8x256xf32> -> vector<8x256xf32>
    %162 = arith.addf %150, %161 : vector<8x256xf32>
    %c7_81 = arith.constant 7 : index
    %c0_82 = arith.constant 0 : index
    %c0_83 = arith.constant 0 : index
    %163 = vector.load %arg3[%c7_81, %c0_82, %c0_83] : memref<9x8x8xf32, #tpu.memory_space<vmem>>, vector<1x8x8xf32>
    %164 = vector.shape_cast %163 : vector<1x8x8xf32> to vector<8x8xf32>
    %cst_84 = arith.constant dense<0.000000e+00> : vector<8x256xf32>
    %165 = tpu.matmul %164, %111, %cst_84 {dimension_numbers = #tpu.dot_dimension_numbers<[1], [0], [0], [1], [0, 0, 1, 1], [], []>} : vector<8x8xf32>, vector<8x256xf32>, vector<8x256xf32> -> vector<8x256xf32>
    %166 = arith.addf %162, %165 : vector<8x256xf32>
    %c8_85 = arith.constant 8 : index
    %c0_86 = arith.constant 0 : index
    %c0_87 = arith.constant 0 : index
    %167 = vector.load %arg3[%c8_85, %c0_86, %c0_87] : memref<9x8x8xf32, #tpu.memory_space<vmem>>, vector<1x8x8xf32>
    %168 = vector.shape_cast %167 : vector<1x8x8xf32> to vector<8x8xf32>
    %cst_88 = arith.constant dense<0.000000e+00> : vector<8x256xf32>
    %169 = tpu.matmul %168, %158, %cst_88 {dimension_numbers = #tpu.dot_dimension_numbers<[1], [0], [0], [1], [0, 0, 1, 1], [], []>} : vector<8x8xf32>, vector<8x256xf32>, vector<8x256xf32> -> vector<8x256xf32>
    %170 = arith.addf %166, %169 : vector<8x256xf32>
    %cst_89 = arith.constant dense<0.000000e+00> : vector<8xf32>
    %171 = vector.multi_reduction <add>, %170, %cst_89 [1] : vector<8x256xf32> to vector<8xf32>
    %172 = vector.shape_cast %171 : vector<8xf32> to vector<8x1xf32>
    %173 = arith.mulf %170, %170 : vector<8x256xf32>
    %cst_90 = arith.constant dense<0.000000e+00> : vector<8xf32>
    %174 = vector.multi_reduction <add>, %173, %cst_90 [1] : vector<8x256xf32> to vector<8xf32>
    %175 = vector.shape_cast %174 : vector<8xf32> to vector<8x1xf32>
    %cst_91 = arith.constant 3.906250e-03 : f32
    %176 = vector.broadcast %cst_91 : f32 to vector<8x1xf32>
    %177 = arith.mulf %172, %176 : vector<8x1xf32>
    %cst_92 = arith.constant 3.906250e-03 : f32
    %178 = vector.broadcast %cst_92 : f32 to vector<8x1xf32>
    %179 = arith.mulf %175, %178 : vector<8x1xf32>
    %180 = arith.mulf %177, %177 : vector<8x1xf32>
    %181 = arith.subf %179, %180 : vector<8x1xf32>
    %cst_93 = arith.constant 0.000000e+00 : f32
    %182 = vector.broadcast %cst_93 : f32 to vector<8x1xf32>
    %183 = arith.maximumf %181, %182 : vector<8x1xf32>
    %184 = vector.broadcast %177 : vector<8x1xf32> to vector<8x256xf32>
    %185 = arith.subf %170, %184 : vector<8x256xf32>
    %cst_94 = arith.constant 9.99999974E-6 : f32
    %186 = vector.broadcast %cst_94 : f32 to vector<8x1xf32>
    %187 = arith.addf %183, %186 : vector<8x1xf32>
    %188 = math.rsqrt %187 : vector<8x1xf32>
    %189 = vector.broadcast %188 : vector<8x1xf32> to vector<8x256xf32>
    %190 = arith.mulf %185, %189 : vector<8x256xf32>
    %191 = arith.addf %1, %190 : vector<8x256xf32>
    %c0_95 = arith.constant 0 : index
    %c0_96 = arith.constant 0 : index
    %c0_97 = arith.constant 0 : index
    %192 = vector.load %arg5[%c0_95, %c0_96, %c0_97] : memref<1x8x256xf32, #tpu.memory_space<vmem>>, vector<1x8x256xf32>
    %193 = vector.shape_cast %192 : vector<1x8x256xf32> to vector<8x256xf32>
    %194 = vector.shape_cast %191 : vector<8x256xf32> to vector<1x8x256xf32>
    tpu.vector_store %arg5[%c0_95, %c0_96, %c0_97], %194 {strides = array<i32>} : memref<1x8x256xf32, #tpu.memory_space<vmem>>, vector<1x8x256xf32>,
    return
  }
  func.func @transform_0(%arg0: i32) -> (i32, i32, i32) {
    %c0_i32 = arith.constant 0 : i32
    %c0_i32_0 = arith.constant 0 : i32
    %c0_i32_1 = arith.constant 0 : i32
    return %arg0, %c0_i32, %c0_i32_0 : i32, i32, i32
  }
  func.func @transform_1(%arg0: i32) -> (i32, i32, i32) {
    %c0_i32 = arith.constant 0 : i32
    %c0_i32_0 = arith.constant 0 : i32
    %c0_i32_1 = arith.constant 0 : i32
    %c0_i32_2 = arith.constant 0 : i32
    return %c0_i32, %c0_i32_0, %c0_i32_1 : i32, i32, i32
  }
  func.func @transform_2(%arg0: i32) -> (i32, i32, i32) {
    %c0_i32 = arith.constant 0 : i32
    %c0_i32_0 = arith.constant 0 : i32
    %c0_i32_1 = arith.constant 0 : i32
    %c0_i32_2 = arith.constant 0 : i32
    return %c0_i32, %c0_i32_0, %c0_i32_1 : i32, i32, i32
  }
  func.func @transform_3(%arg0: i32) -> (i32, i32) {
    %c0_i32 = arith.constant 0 : i32
    %c0_i32_0 = arith.constant 0 : i32
    %c0_i32_1 = arith.constant 0 : i32
    return %c0_i32, %c0_i32_0 : i32, i32
  }
  func.func @transform_4(%arg0: i32) -> (i32, i32, i32) {
    %c0_i32 = arith.constant 0 : i32
    %c0_i32_0 = arith.constant 0 : i32
    %c0_i32_1 = arith.constant 0 : i32
    return %arg0, %c0_i32, %c0_i32_0 : i32, i32, i32
  }
}

module attributes {stable_mosaic.version = 11 : i64} {
  func.func @residual_block_kernel(%arg0: i32, %arg1: memref<1x8x256xf32, #tpu.memory_space<vmem>>, %arg2: memref<9x8x8xf32, #tpu.memory_space<vmem>>, %arg3: memref<9x8x8xf32, #tpu.memory_space<vmem>>, %arg4: memref<8x256xi32, #tpu.memory_space<vmem>>, %arg5: memref<1x8x256xf32, #tpu.memory_space<vmem>>) attributes {dimension_semantics = [#tpu.dimension_semantics<parallel>], iteration_bounds = array<i64: 2>, scalar_prefetch = 0 : i64, scratch_operands = 0 : i64, tpu.core_type = #tpu.core_type<tc>, window_params = [{transform_indices = @transform_0, window_bounds = array<i64: 1, 8, 256>}, {pipeline_mode = #tpu.pipeline_mode<synchronous>, transform_indices = @transform_1, window_bounds = array<i64: 9, 8, 8>}, {pipeline_mode = #tpu.pipeline_mode<synchronous>, transform_indices = @transform_2, window_bounds = array<i64: 9, 8, 8>}, {pipeline_mode = #tpu.pipeline_mode<synchronous>, transform_indices = @transform_3, window_bounds = array<i64: 8, 256>}, {transform_indices = @transform_4, window_bounds = array<i64: 1, 8, 256>}]} {
    %c0 = arith.constant 0 : index
    %c0_0 = arith.constant 0 : index
    %c0_1 = arith.constant 0 : index
    %0 = vector.load %arg1[%c0, %c0_0, %c0_1] : memref<1x8x256xf32, #tpu.memory_space<vmem>>, vector<1x8x256xf32>
    %1 = vector.shape_cast %0 : vector<1x8x256xf32> to vector<8x256xf32>
    %c0_2 = arith.constant 0 : index
    %c0_3 = arith.constant 0 : index
    %2 = vector.load %arg4[%c0_2, %c0_3] : memref<8x256xi32, #tpu.memory_space<vmem>>, vector<8x256xi32>
    %3 = vector.extract_strided_slice %2 {offsets = [0, 0], sizes = [1, 256], strides = [1, 1]} : vector<8x256xi32> to vector<1x256xi32>
    %c0_i32 = arith.constant 0 : i32
    %4 = vector.broadcast %c0_i32 : i32 to vector<1x256xi32>
    %5 = arith.cmpi ne, %3, %4 : vector<1x256xi32>
    %6 = vector.extract_strided_slice %2 {offsets = [1, 0], sizes = [1, 256], strides = [1, 1]} : vector<8x256xi32> to vector<1x256xi32>
    %c0_i32_4 = arith.constant 0 : i32
    %7 = vector.broadcast %c0_i32_4 : i32 to vector<1x256xi32>
    %8 = arith.cmpi ne, %6, %7 : vector<1x256xi32>
    %9 = vector.extract_strided_slice %2 {offsets = [2, 0], sizes = [1, 256], strides = [1, 1]} : vector<8x256xi32> to vector<1x256xi32>
    %c0_i32_5 = arith.constant 0 : i32
    %10 = vector.broadcast %c0_i32_5 : i32 to vector<1x256xi32>
    %11 = arith.cmpi ne, %9, %10 : vector<1x256xi32>
    %12 = vector.extract_strided_slice %2 {offsets = [3, 0], sizes = [1, 256], strides = [1, 1]} : vector<8x256xi32> to vector<1x256xi32>
    %c0_i32_6 = arith.constant 0 : i32
    %13 = vector.broadcast %c0_i32_6 : i32 to vector<1x256xi32>
    %14 = arith.cmpi ne, %12, %13 : vector<1x256xi32>
    %c16_i32 = arith.constant 16 : i32
    %15 = tpu.dynamic_rotate %1 by %c16_i32 dim 1 : vector<8x256xf32>, i32 -> vector<8x256xf32>
    %c240_i32 = arith.constant 240 : i32
    %16 = tpu.dynamic_rotate %1 by %c240_i32 dim 1 : vector<8x256xf32>, i32 -> vector<8x256xf32>
    %17 = vector.shape_cast %5 : vector<1x256xi1> to vector<1x256xi1>
    %18 = vector.broadcast %17 : vector<1x256xi1> to vector<8x256xi1>
    %19 = arith.select %18, %16, %15 : vector<8x256xi1>, vector<8x256xf32>
    %20 = vector.shape_cast %8 : vector<1x256xi1> to vector<1x256xi1>
    %21 = vector.broadcast %20 : vector<1x256xi1> to vector<8x256xi1>
    %22 = arith.select %21, %15, %16 : vector<8x256xi1>, vector<8x256xf32>
    %c1_i32 = arith.constant 1 : i32
    %23 = tpu.dynamic_rotate %19 by %c1_i32 dim 1 : vector<8x256xf32>, i32 -> vector<8x256xf32>
    %c255_i32 = arith.constant 255 : i32
    %24 = tpu.dynamic_rotate %19 by %c255_i32 dim 1 : vector<8x256xf32>, i32 -> vector<8x256xf32>
    %25 = vector.shape_cast %11 : vector<1x256xi1> to vector<1x256xi1>
    %26 = vector.broadcast %25 : vector<1x256xi1> to vector<8x256xi1>
    %27 = arith.select %26, %24, %23 : vector<8x256xi1>, vector<8x256xf32>
    %28 = vector.shape_cast %14 : vector<1x256xi1> to vector<1x256xi1>
    %29 = vector.broadcast %28 : vector<1x256xi1> to vector<8x256xi1>
    %30 = arith.select %29, %23, %24 : vector<8x256xi1>, vector<8x256xf32>
    %c0_7 = arith.constant 0 : index
    %c0_8 = arith.constant 0 : index
    %c0_9 = arith.constant 0 : index
    %31 = vector.load %arg2[%c0_7, %c0_8, %c0_9] : memref<9x8x8xf32, #tpu.memory_space<vmem>>, vector<1x8x8xf32>
    %32 = vector.shape_cast %31 : vector<1x8x8xf32> to vector<8x8xf32>
    %cst = arith.constant dense<0.000000e+00> : vector<8x256xf32>
    %33 = tpu.matmul %32, %27, %cst {dimension_numbers = #tpu.dot_dimension_numbers<[1], [0], [0], [1], [0, 0, 1, 1], [], []>} : vector<8x8xf32>, vector<8x256xf32>, vector<8x256xf32> -> vector<8x256xf32>
    %c1 = arith.constant 1 : index
    %c0_10 = arith.constant 0 : index
    %c0_11 = arith.constant 0 : index
    %34 = vector.load %arg2[%c1, %c0_10, %c0_11] : memref<9x8x8xf32, #tpu.memory_space<vmem>>, vector<1x8x8xf32>
    %35 = vector.shape_cast %34 : vector<1x8x8xf32> to vector<8x8xf32>
    %cst_12 = arith.constant dense<0.000000e+00> : vector<8x256xf32>
    %36 = tpu.matmul %35, %19, %cst_12 {dimension_numbers = #tpu.dot_dimension_numbers<[1], [0], [0], [1], [0, 0, 1, 1], [], []>} : vector<8x8xf32>, vector<8x256xf32>, vector<8x256xf32> -> vector<8x256xf32>
    %37 = arith.addf %33, %36 : vector<8x256xf32>
    %c2 = arith.constant 2 : index
    %c0_13 = arith.constant 0 : index
    %c0_14 = arith.constant 0 : index
    %38 = vector.load %arg2[%c2, %c0_13, %c0_14] : memref<9x8x8xf32, #tpu.memory_space<vmem>>, vector<1x8x8xf32>
    %39 = vector.shape_cast %38 : vector<1x8x8xf32> to vector<8x8xf32>
    %cst_15 = arith.constant dense<0.000000e+00> : vector<8x256xf32>
    %40 = tpu.matmul %39, %30, %cst_15 {dimension_numbers = #tpu.dot_dimension_numbers<[1], [0], [0], [1], [0, 0, 1, 1], [], []>} : vector<8x8xf32>, vector<8x256xf32>, vector<8x256xf32> -> vector<8x256xf32>
    %41 = arith.addf %37, %40 : vector<8x256xf32>
    %c1_i32_16 = arith.constant 1 : i32
    %42 = tpu.dynamic_rotate %1 by %c1_i32_16 dim 1 : vector<8x256xf32>, i32 -> vector<8x256xf32>
    %c255_i32_17 = arith.constant 255 : i32
    %43 = tpu.dynamic_rotate %1 by %c255_i32_17 dim 1 : vector<8x256xf32>, i32 -> vector<8x256xf32>
    %44 = vector.shape_cast %11 : vector<1x256xi1> to vector<1x256xi1>
    %45 = vector.broadcast %44 : vector<1x256xi1> to vector<8x256xi1>
    %46 = arith.select %45, %43, %42 : vector<8x256xi1>, vector<8x256xf32>
    %47 = vector.shape_cast %14 : vector<1x256xi1> to vector<1x256xi1>
    %48 = vector.broadcast %47 : vector<1x256xi1> to vector<8x256xi1>
    %49 = arith.select %48, %42, %43 : vector<8x256xi1>, vector<8x256xf32>
    %c3 = arith.constant 3 : index
    %c0_18 = arith.constant 0 : index
    %c0_19 = arith.constant 0 : index
    %50 = vector.load %arg2[%c3, %c0_18, %c0_19] : memref<9x8x8xf32, #tpu.memory_space<vmem>>, vector<1x8x8xf32>
    %51 = vector.shape_cast %50 : vector<1x8x8xf32> to vector<8x8xf32>
    %cst_20 = arith.constant dense<0.000000e+00> : vector<8x256xf32>
    %52 = tpu.matmul %51, %46, %cst_20 {dimension_numbers = #tpu.dot_dimension_numbers<[1], [0], [0], [1], [0, 0, 1, 1], [], []>} : vector<8x8xf32>, vector<8x256xf32>, vector<8x256xf32> -> vector<8x256xf32>
    %53 = arith.addf %41, %52 : vector<8x256xf32>
    %c4 = arith.constant 4 : index
    %c0_21 = arith.constant 0 : index
    %c0_22 = arith.constant 0 : index
    %54 = vector.load %arg2[%c4, %c0_21, %c0_22] : memref<9x8x8xf32, #tpu.memory_space<vmem>>, vector<1x8x8xf32>
    %55 = vector.shape_cast %54 : vector<1x8x8xf32> to vector<8x8xf32>
    %cst_23 = arith.constant dense<0.000000e+00> : vector<8x256xf32>
    %56 = tpu.matmul %55, %1, %cst_23 {dimension_numbers = #tpu.dot_dimension_numbers<[1], [0], [0], [1], [0, 0, 1, 1], [], []>} : vector<8x8xf32>, vector<8x256xf32>, vector<8x256xf32> -> vector<8x256xf32>
    %57 = arith.addf %53, %56 : vector<8x256xf32>
    %c5 = arith.constant 5 : index
    %c0_24 = arith.constant 0 : index
    %c0_25 = arith.constant 0 : index
    %58 = vector.load %arg2[%c5, %c0_24, %c0_25] : memref<9x8x8xf32, #tpu.memory_space<vmem>>, vector<1x8x8xf32>
    %59 = vector.shape_cast %58 : vector<1x8x8xf32> to vector<8x8xf32>
    %cst_26 = arith.constant dense<0.000000e+00> : vector<8x256xf32>
    %60 = tpu.matmul %59, %49, %cst_26 {dimension_numbers = #tpu.dot_dimension_numbers<[1], [0], [0], [1], [0, 0, 1, 1], [], []>} : vector<8x8xf32>, vector<8x256xf32>, vector<8x256xf32> -> vector<8x256xf32>
    %61 = arith.addf %57, %60 : vector<8x256xf32>
    %c1_i32_27 = arith.constant 1 : i32
    %62 = tpu.dynamic_rotate %22 by %c1_i32_27 dim 1 : vector<8x256xf32>, i32 -> vector<8x256xf32>
    %c255_i32_28 = arith.constant 255 : i32
    %63 = tpu.dynamic_rotate %22 by %c255_i32_28 dim 1 : vector<8x256xf32>, i32 -> vector<8x256xf32>
    %64 = vector.shape_cast %11 : vector<1x256xi1> to vector<1x256xi1>
    %65 = vector.broadcast %64 : vector<1x256xi1> to vector<8x256xi1>
    %66 = arith.select %65, %63, %62 : vector<8x256xi1>, vector<8x256xf32>
    %67 = vector.shape_cast %14 : vector<1x256xi1> to vector<1x256xi1>
    %68 = vector.broadcast %67 : vector<1x256xi1> to vector<8x256xi1>
    %69 = arith.select %68, %62, %63 : vector<8x256xi1>, vector<8x256xf32>
    %c6 = arith.constant 6 : index
    %c0_29 = arith.constant 0 : index
    %c0_30 = arith.constant 0 : index
    %70 = vector.load %arg2[%c6, %c0_29, %c0_30] : memref<9x8x8xf32, #tpu.memory_space<vmem>>, vector<1x8x8xf32>
    %71 = vector.shape_cast %70 : vector<1x8x8xf32> to vector<8x8xf32>
    %cst_31 = arith.constant dense<0.000000e+00> : vector<8x256xf32>
    %72 = tpu.matmul %71, %66, %cst_31 {dimension_numbers = #tpu.dot_dimension_numbers<[1], [0], [0], [1], [0, 0, 1, 1], [], []>} : vector<8x8xf32>, vector<8x256xf32>, vector<8x256xf32> -> vector<8x256xf32>
    %73 = arith.addf %61, %72 : vector<8x256xf32>
    %c7 = arith.constant 7 : index
    %c0_32 = arith.constant 0 : index
    %c0_33 = arith.constant 0 : index
    %74 = vector.load %arg2[%c7, %c0_32, %c0_33] : memref<9x8x8xf32, #tpu.memory_space<vmem>>, vector<1x8x8xf32>
    %75 = vector.shape_cast %74 : vector<1x8x8xf32> to vector<8x8xf32>
    %cst_34 = arith.constant dense<0.000000e+00> : vector<8x256xf32>
    %76 = tpu.matmul %75, %22, %cst_34 {dimension_numbers = #tpu.dot_dimension_numbers<[1], [0], [0], [1], [0, 0, 1, 1], [], []>} : vector<8x8xf32>, vector<8x256xf32>, vector<8x256xf32> -> vector<8x256xf32>
    %77 = arith.addf %73, %76 : vector<8x256xf32>
    %c8 = arith.constant 8 : index
    %c0_35 = arith.constant 0 : index
    %c0_36 = arith.constant 0 : index
    %78 = vector.load %arg2[%c8, %c0_35, %c0_36] : memref<9x8x8xf32, #tpu.memory_space<vmem>>, vector<1x8x8xf32>
    %79 = vector.shape_cast %78 : vector<1x8x8xf32> to vector<8x8xf32>
    %cst_37 = arith.constant dense<0.000000e+00> : vector<8x256xf32>
    %80 = tpu.matmul %79, %69, %cst_37 {dimension_numbers = #tpu.dot_dimension_numbers<[1], [0], [0], [1], [0, 0, 1, 1], [], []>} : vector<8x8xf32>, vector<8x256xf32>, vector<8x256xf32> -> vector<8x256xf32>
    %81 = arith.addf %77, %80 : vector<8x256xf32>
    %cst_38 = arith.constant dense<0.000000e+00> : vector<8xf32>
    %82 = vector.multi_reduction <add>, %81, %cst_38 [1] : vector<8x256xf32> to vector<8xf32>
    %83 = vector.shape_cast %82 : vector<8xf32> to vector<8x1xf32>
    %84 = arith.mulf %81, %81 : vector<8x256xf32>
    %cst_39 = arith.constant dense<0.000000e+00> : vector<8xf32>
    %85 = vector.multi_reduction <add>, %84, %cst_39 [1] : vector<8x256xf32> to vector<8xf32>
    %86 = vector.shape_cast %85 : vector<8xf32> to vector<8x1xf32>
    %cst_40 = arith.constant 3.906250e-03 : f32
    %87 = vector.broadcast %cst_40 : f32 to vector<8x1xf32>
    %88 = arith.mulf %83, %87 : vector<8x1xf32>
    %cst_41 = arith.constant 3.906250e-03 : f32
    %89 = vector.broadcast %cst_41 : f32 to vector<8x1xf32>
    %90 = arith.mulf %86, %89 : vector<8x1xf32>
    %91 = arith.mulf %88, %88 : vector<8x1xf32>
    %92 = arith.subf %90, %91 : vector<8x1xf32>
    %cst_42 = arith.constant 0.000000e+00 : f32
    %93 = vector.broadcast %cst_42 : f32 to vector<8x1xf32>
    %94 = arith.maximumf %92, %93 : vector<8x1xf32>
    %95 = vector.broadcast %88 : vector<8x1xf32> to vector<8x256xf32>
    %96 = arith.subf %81, %95 : vector<8x256xf32>
    %cst_43 = arith.constant 9.99999974E-6 : f32
    %97 = vector.broadcast %cst_43 : f32 to vector<8x1xf32>
    %98 = arith.addf %94, %97 : vector<8x1xf32>
    %99 = math.rsqrt %98 : vector<8x1xf32>
    %100 = vector.broadcast %99 : vector<8x1xf32> to vector<8x256xf32>
    %101 = arith.mulf %96, %100 : vector<8x256xf32>
    %cst_44 = arith.constant 0.000000e+00 : f32
    %102 = vector.broadcast %cst_44 : f32 to vector<8x256xf32>
    %103 = arith.maximumf %101, %102 : vector<8x256xf32>
    %c16_i32_45 = arith.constant 16 : i32
    %104 = tpu.dynamic_rotate %103 by %c16_i32_45 dim 1 : vector<8x256xf32>, i32 -> vector<8x256xf32>
    %c240_i32_46 = arith.constant 240 : i32
    %105 = tpu.dynamic_rotate %103 by %c240_i32_46 dim 1 : vector<8x256xf32>, i32 -> vector<8x256xf32>
    %106 = vector.shape_cast %5 : vector<1x256xi1> to vector<1x256xi1>
    %107 = vector.broadcast %106 : vector<1x256xi1> to vector<8x256xi1>
    %108 = arith.select %107, %105, %104 : vector<8x256xi1>, vector<8x256xf32>
    %109 = vector.shape_cast %8 : vector<1x256xi1> to vector<1x256xi1>
    %110 = vector.broadcast %109 : vector<1x256xi1> to vector<8x256xi1>
    %111 = arith.select %110, %104, %105 : vector<8x256xi1>, vector<8x256xf32>
    %c1_i32_47 = arith.constant 1 : i32
    %112 = tpu.dynamic_rotate %108 by %c1_i32_47 dim 1 : vector<8x256xf32>, i32 -> vector<8x256xf32>
    %c255_i32_48 = arith.constant 255 : i32
    %113 = tpu.dynamic_rotate %108 by %c255_i32_48 dim 1 : vector<8x256xf32>, i32 -> vector<8x256xf32>
    %114 = vector.shape_cast %11 : vector<1x256xi1> to vector<1x256xi1>
    %115 = vector.broadcast %114 : vector<1x256xi1> to vector<8x256xi1>
    %116 = arith.select %115, %113, %112 : vector<8x256xi1>, vector<8x256xf32>
    %117 = vector.shape_cast %14 : vector<1x256xi1> to vector<1x256xi1>
    %118 = vector.broadcast %117 : vector<1x256xi1> to vector<8x256xi1>
    %119 = arith.select %118, %112, %113 : vector<8x256xi1>, vector<8x256xf32>
    %c0_49 = arith.constant 0 : index
    %c0_50 = arith.constant 0 : index
    %c0_51 = arith.constant 0 : index
    %120 = vector.load %arg3[%c0_49, %c0_50, %c0_51] : memref<9x8x8xf32, #tpu.memory_space<vmem>>, vector<1x8x8xf32>
    %121 = vector.shape_cast %120 : vector<1x8x8xf32> to vector<8x8xf32>
    %cst_52 = arith.constant dense<0.000000e+00> : vector<8x256xf32>
    %122 = tpu.matmul %121, %116, %cst_52 {dimension_numbers = #tpu.dot_dimension_numbers<[1], [0], [0], [1], [0, 0, 1, 1], [], []>} : vector<8x8xf32>, vector<8x256xf32>, vector<8x256xf32> -> vector<8x256xf32>
    %c1_53 = arith.constant 1 : index
    %c0_54 = arith.constant 0 : index
    %c0_55 = arith.constant 0 : index
    %123 = vector.load %arg3[%c1_53, %c0_54, %c0_55] : memref<9x8x8xf32, #tpu.memory_space<vmem>>, vector<1x8x8xf32>
    %124 = vector.shape_cast %123 : vector<1x8x8xf32> to vector<8x8xf32>
    %cst_56 = arith.constant dense<0.000000e+00> : vector<8x256xf32>
    %125 = tpu.matmul %124, %108, %cst_56 {dimension_numbers = #tpu.dot_dimension_numbers<[1], [0], [0], [1], [0, 0, 1, 1], [], []>} : vector<8x8xf32>, vector<8x256xf32>, vector<8x256xf32> -> vector<8x256xf32>
    %126 = arith.addf %122, %125 : vector<8x256xf32>
    %c2_57 = arith.constant 2 : index
    %c0_58 = arith.constant 0 : index
    %c0_59 = arith.constant 0 : index
    %127 = vector.load %arg3[%c2_57, %c0_58, %c0_59] : memref<9x8x8xf32, #tpu.memory_space<vmem>>, vector<1x8x8xf32>
    %128 = vector.shape_cast %127 : vector<1x8x8xf32> to vector<8x8xf32>
    %cst_60 = arith.constant dense<0.000000e+00> : vector<8x256xf32>
    %129 = tpu.matmul %128, %119, %cst_60 {dimension_numbers = #tpu.dot_dimension_numbers<[1], [0], [0], [1], [0, 0, 1, 1], [], []>} : vector<8x8xf32>, vector<8x256xf32>, vector<8x256xf32> -> vector<8x256xf32>
    %130 = arith.addf %126, %129 : vector<8x256xf32>
    %c1_i32_61 = arith.constant 1 : i32
    %131 = tpu.dynamic_rotate %103 by %c1_i32_61 dim 1 : vector<8x256xf32>, i32 -> vector<8x256xf32>
    %c255_i32_62 = arith.constant 255 : i32
    %132 = tpu.dynamic_rotate %103 by %c255_i32_62 dim 1 : vector<8x256xf32>, i32 -> vector<8x256xf32>
    %133 = vector.shape_cast %11 : vector<1x256xi1> to vector<1x256xi1>
    %134 = vector.broadcast %133 : vector<1x256xi1> to vector<8x256xi1>
    %135 = arith.select %134, %132, %131 : vector<8x256xi1>, vector<8x256xf32>
    %136 = vector.shape_cast %14 : vector<1x256xi1> to vector<1x256xi1>
    %137 = vector.broadcast %136 : vector<1x256xi1> to vector<8x256xi1>
    %138 = arith.select %137, %131, %132 : vector<8x256xi1>, vector<8x256xf32>
    %c3_63 = arith.constant 3 : index
    %c0_64 = arith.constant 0 : index
    %c0_65 = arith.constant 0 : index
    %139 = vector.load %arg3[%c3_63, %c0_64, %c0_65] : memref<9x8x8xf32, #tpu.memory_space<vmem>>, vector<1x8x8xf32>
    %140 = vector.shape_cast %139 : vector<1x8x8xf32> to vector<8x8xf32>
    %cst_66 = arith.constant dense<0.000000e+00> : vector<8x256xf32>
    %141 = tpu.matmul %140, %135, %cst_66 {dimension_numbers = #tpu.dot_dimension_numbers<[1], [0], [0], [1], [0, 0, 1, 1], [], []>} : vector<8x8xf32>, vector<8x256xf32>, vector<8x256xf32> -> vector<8x256xf32>
    %142 = arith.addf %130, %141 : vector<8x256xf32>
    %c4_67 = arith.constant 4 : index
    %c0_68 = arith.constant 0 : index
    %c0_69 = arith.constant 0 : index
    %143 = vector.load %arg3[%c4_67, %c0_68, %c0_69] : memref<9x8x8xf32, #tpu.memory_space<vmem>>, vector<1x8x8xf32>
    %144 = vector.shape_cast %143 : vector<1x8x8xf32> to vector<8x8xf32>
    %cst_70 = arith.constant dense<0.000000e+00> : vector<8x256xf32>
    %145 = tpu.matmul %144, %103, %cst_70 {dimension_numbers = #tpu.dot_dimension_numbers<[1], [0], [0], [1], [0, 0, 1, 1], [], []>} : vector<8x8xf32>, vector<8x256xf32>, vector<8x256xf32> -> vector<8x256xf32>
    %146 = arith.addf %142, %145 : vector<8x256xf32>
    %c5_71 = arith.constant 5 : index
    %c0_72 = arith.constant 0 : index
    %c0_73 = arith.constant 0 : index
    %147 = vector.load %arg3[%c5_71, %c0_72, %c0_73] : memref<9x8x8xf32, #tpu.memory_space<vmem>>, vector<1x8x8xf32>
    %148 = vector.shape_cast %147 : vector<1x8x8xf32> to vector<8x8xf32>
    %cst_74 = arith.constant dense<0.000000e+00> : vector<8x256xf32>
    %149 = tpu.matmul %148, %138, %cst_74 {dimension_numbers = #tpu.dot_dimension_numbers<[1], [0], [0], [1], [0, 0, 1, 1], [], []>} : vector<8x8xf32>, vector<8x256xf32>, vector<8x256xf32> -> vector<8x256xf32>
    %150 = arith.addf %146, %149 : vector<8x256xf32>
    %c1_i32_75 = arith.constant 1 : i32
    %151 = tpu.dynamic_rotate %111 by %c1_i32_75 dim 1 : vector<8x256xf32>, i32 -> vector<8x256xf32>
    %c255_i32_76 = arith.constant 255 : i32
    %152 = tpu.dynamic_rotate %111 by %c255_i32_76 dim 1 : vector<8x256xf32>, i32 -> vector<8x256xf32>
    %153 = vector.shape_cast %11 : vector<1x256xi1> to vector<1x256xi1>
    %154 = vector.broadcast %153 : vector<1x256xi1> to vector<8x256xi1>
    %155 = arith.select %154, %152, %151 : vector<8x256xi1>, vector<8x256xf32>
    %156 = vector.shape_cast %14 : vector<1x256xi1> to vector<1x256xi1>
    %157 = vector.broadcast %156 : vector<1x256xi1> to vector<8x256xi1>
    %158 = arith.select %157, %151, %152 : vector<8x256xi1>, vector<8x256xf32>
    %c6_77 = arith.constant 6 : index
    %c0_78 = arith.constant 0 : index
    %c0_79 = arith.constant 0 : index
    %159 = vector.load %arg3[%c6_77, %c0_78, %c0_79] : memref<9x8x8xf32, #tpu.memory_space<vmem>>, vector<1x8x8xf32>
    %160 = vector.shape_cast %159 : vector<1x8x8xf32> to vector<8x8xf32>
    %cst_80 = arith.constant dense<0.000000e+00> : vector<8x256xf32>
    %161 = tpu.matmul %160, %155, %cst_80 {dimension_numbers = #tpu.dot_dimension_numbers<[1], [0], [0], [1], [0, 0, 1, 1], [], []>} : vector<8x8xf32>, vector<8x256xf32>, vector<8x256xf32> -> vector<8x256xf32>
    %162 = arith.addf %150, %161 : vector<8x256xf32>
    %c7_81 = arith.constant 7 : index
    %c0_82 = arith.constant 0 : index
    %c0_83 = arith.constant 0 : index
    %163 = vector.load %arg3[%c7_81, %c0_82, %c0_83] : memref<9x8x8xf32, #tpu.memory_space<vmem>>, vector<1x8x8xf32>
    %164 = vector.shape_cast %163 : vector<1x8x8xf32> to vector<8x8xf32>
    %cst_84 = arith.constant dense<0.000000e+00> : vector<8x256xf32>
    %165 = tpu.matmul %164, %111, %cst_84 {dimension_numbers = #tpu.dot_dimension_numbers<[1], [0], [0], [1], [0, 0, 1, 1], [], []>} : vector<8x8xf32>, vector<8x256xf32>, vector<8x256xf32> -> vector<8x256xf32>
    %166 = arith.addf %162, %165 : vector<8x256xf32>
    %c8_85 = arith.constant 8 : index
    %c0_86 = arith.constant 0 : index
    %c0_87 = arith.constant 0 : index
    %167 = vector.load %arg3[%c8_85, %c0_86, %c0_87] : memref<9x8x8xf32, #tpu.memory_space<vmem>>, vector<1x8x8xf32>
    %168 = vector.shape_cast %167 : vector<1x8x8xf32> to vector<8x8xf32>
    %cst_88 = arith.constant dense<0.000000e+00> : vector<8x256xf32>
    %169 = tpu.matmul %168, %158, %cst_88 {dimension_numbers = #tpu.dot_dimension_numbers<[1], [0], [0], [1], [0, 0, 1, 1], [], []>} : vector<8x8xf32>, vector<8x256xf32>, vector<8x256xf32> -> vector<8x256xf32>
    %170 = arith.addf %166, %169 : vector<8x256xf32>
    %cst_89 = arith.constant dense<0.000000e+00> : vector<8xf32>
    %171 = vector.multi_reduction <add>, %170, %cst_89 [1] : vector<8x256xf32> to vector<8xf32>
    %172 = vector.shape_cast %171 : vector<8xf32> to vector<8x1xf32>
    %173 = arith.mulf %170, %170 : vector<8x256xf32>
    %cst_90 = arith.constant dense<0.000000e+00> : vector<8xf32>
    %174 = vector.multi_reduction <add>, %173, %cst_90 [1] : vector<8x256xf32> to vector<8xf32>
    %175 = vector.shape_cast %174 : vector<8xf32> to vector<8x1xf32>
    %cst_91 = arith.constant 3.906250e-03 : f32
    %176 = vector.broadcast %cst_91 : f32 to vector<8x1xf32>
    %177 = arith.mulf %172, %176 : vector<8x1xf32>
    %cst_92 = arith.constant 3.906250e-03 : f32
    %178 = vector.broadcast %cst_92 : f32 to vector<8x1xf32>
    %179 = arith.mulf %175, %178 : vector<8x1xf32>
    %180 = arith.mulf %177, %177 : vector<8x1xf32>
    %181 = arith.subf %179, %180 : vector<8x1xf32>
    %cst_93 = arith.constant 0.000000e+00 : f32
    %182 = vector.broadcast %cst_93 : f32 to vector<8x1xf32>
    %183 = arith.maximumf %181, %182 : vector<8x1xf32>
    %184 = vector.broadcast %177 : vector<8x1xf32> to vector<8x256xf32>
    %185 = arith.subf %170, %184 : vector<8x256xf32>
    %cst_94 = arith.constant 9.99999974E-6 : f32
    %186 = vector.broadcast %cst_94 : f32 to vector<8x1xf32>
    %187 = arith.addf %183, %186 : vector<8x1xf32>
    %188 = math.rsqrt %187 : vector<8x1xf32>
    %189 = vector.broadcast %188 : vector<8x1xf32> to vector<8x256xf32>
    %190 = arith.mulf %185, %189 : vector<8x256xf32>
    %191 = arith.addf %1, %190 : vector<8x256xf32>
    %c0_95 = arith.constant 0 : index
    %c0_96 = arith.constant 0 : index
    %c0_97 = arith.constant 0 : index
    %192 = vector.load %arg5[%c0_95, %c0_96, %c0_97] : memref<1x8x256xf32, #tpu.memory_space<vmem>>, vector<1x8x256xf32>
    %193 = vector.shape_cast %192 : vector<1x8x256xf32> to vector<8x256xf32>
    %194 = vector.shape_cast %191 : vector<8x256xf32> to vector<1x8x256xf32>
    tpu.vector_store %arg5[%c0_95, %c0_96, %c0_97], %194 {strides = array<i32>} : memref<1x8x256xf32, #tpu.memory_space<vmem>>, vector<1x8x256xf32>,
    return
  }
  func.func @transform_0(%arg0: i32) -> (i32, i32, i32) {
    %c0_i32 = arith.constant 0 : i32
    %c0_i32_0 = arith.constant 0 : i32
    %c0_i32_1 = arith.constant 0 : i32
    return %arg0, %c0_i32, %c0_i32_0 : i32, i32, i32
  }
  func.func @transform_1(%arg0: i32) -> (i32, i32, i32) {
    %c0_i32 = arith.constant 0 : i32
    %c0_i32_0 = arith.constant 0 : i32
    %c0_i32_1 = arith.constant 0 : i32
    %c0_i32_2 = arith.constant 0 : i32
    return %c0_i32, %c0_i32_0, %c0_i32_1 : i32, i32, i32
  }
  func.func @transform_2(%arg0: i32) -> (i32, i32, i32) {
    %c0_i32 = arith.constant 0 : i32
    %c0_i32_0 = arith.constant 0 : i32
    %c0_i32_1 = arith.constant 0 : i32
    %c0_i32_2 = arith.constant 0 : i32
    return %c0_i32, %c0_i32_0, %c0_i32_1 : i32, i32, i32
  }
  func.func @transform_3(%arg0: i32) -> (i32, i32) {
    %c0_i32 = arith.constant 0 : i32
    %c0_i32_0 = arith.constant 0 : i32
    %c0_i32_1 = arith.constant 0 : i32
    return %c0_i32, %c0_i32_0 : i32, i32
  }
  func.func @transform_4(%arg0: i32) -> (i32, i32, i32) {
    %c0_i32 = arith.constant 0 : i32
    %c0_i32_0 = arith.constant 0 : i32
    %c0_i32_1 = arith.constant 0 : i32
    return %arg0, %c0_i32, %c0_i32_0 : i32, i32, i32
  }
}

</mosaic_0001>

<bundles_post_ra>
// kernel: tpu_custom_call.1
= control target key start
LH: loop header
LB: loop body
LE: loop exit
PB: predicated region body
PF: predicated region fallthrough
CT: control target
= control target key end

     0   :  { %9 = vsyncpa [#allocation3], 0  ;;  %s2006_s0 = inlined_call_operand.vmem [shape: f32[2,8,256], index: 0, kind: input, shape index: {}]   ;;  %s2007_s1 = inlined_call_operand.vmem [shape: f32[9,8,8], index: 1, kind: input, shape index: {}]   ;;  %s2008_s2 = inlined_call_operand.vmem [shape: f32[9,8,8], index: 2, kind: input, shape index: {}]   ;;  %s2009_s3 = inlined_call_operand.vmem [shape: s32[8,256], index: 3, kind: input, shape index: {}]   ;;  %s2010_s4 = inlined_call_operand.hbm [shape: f32[2,8,256], index: 4, kind: output, shape index: {}]  }
   0x1   :  { %11 = vsyncpa [#allocation3 + $0x1], 0  ;;  %s1617_s15 = smov 0   ;;  %s1619_s16 = smov 0  }
   0x2   :  { %s1621_s17 = smov 0   ;;  %s1623_s18 = smov 0  }
   0x3 LB: > { %s1638_s19 = sadd.s32 4294967295, %s1585_s18   ;;  %s1329_s20 = sadd.s32 4294967294, %s1585_s18   ;;  %s1585_s18 = sphi %s1623_s18, %s2032_s18   ;;  %s1581_s17 = sphi %s1621_s17, %s2031_s17   ;;  %s1577_s16 = sphi %s1619_s16, %s2030_s16   ;;  %s1573_s15 = sphi %s1617_s15, %s2029_s15  }
   0x4   : > { %s1642_s21 = sadd.s32 1, %s1585_s18   ;;  %s113_s22 = sadd.s32 1, %s1581_s17 }
   0x5   : > { %s110_s23 = ssub.s32 %s1585_s18, %s1642_s21  ;;  %p123_p0 = scmp.ne.s32.totalorder %s1581_s17, %s1577_s16 }
   0x6   : > { %p111_p1 = scmp.eq.s32.totalorder %s110_s23, 0  ;;  %p124_p2 = scmp.eq.s32.totalorder %s1638_s19, 1 }
   0x7   : > { %p129_p3 = scmp.ne.s32.totalorder %s1577_s16, %s1573_s15  ;;  %p130_p4 = scmp.eq.s32.totalorder %s1329_s20, 1 }
   0x8   : > { %s1653_s24 = scalar_select %p111_p1, %s1581_s17, %s113_s22  }
   0x9   : > { %p1655_p5 = por %p124_p2, %p123_p0  ;;  %p1659_p6 = por %p130_p4, %p129_p3 }
   0xa   : > { %p1332_p7 = scmp.ge.s32.totalorder %s1585_s18, 1  ;;  %p165_p8 = scmp.lt.s32.totalorder %s1585_s18, 3 }
   0xc   : > { %p166_p9 = pnand %p1332_p7, %p165_p8 }
   0xd   : > { %p191_p10 = scmp.lt.s32.totalorder (!%p166_p9), %s1638_s19, 1  ;;  %s1587_s6 = smov (!%p166_p9), 16  }
   0xe   : > { %169 = sbr.rel (%p166_p9) target bundleno = 1168 (0x490), region = 36  ;;  %s1588_s7 = smov (!%p166_p9), 112  }
   0xf   : > { %s1590_s12 = smov (!%p166_p9), 1   ;;  %s1591_s13 = smov (!%p166_p9), 127  }
  0x10   : > { %s1543_s22 = scalar_lea.hbm (!%p166_p9), %s2010_s4, 32 }
  0x13   : > { %s192_s27 = scalar_select %p191_p10, %s1638_s19, 1  ;;  %v198_v3 = vld [vmem:[%s2009_s3] sm:$0xff]  ;;  %v199_v4 = vld [vmem:[%s2009_s3 + $0x8] sm:$0xff]  ;;  %v206_v6 = vlaneseq  ;;  %v1589_v7 = vmov 0   ;;  %vm261_vm8 = vcmask 64512   ;;  %v1382_v49 = vld [vmem:[%s2008_s2 + $0x38] sm:$0xff] }
  0x14   : > { %vm200_vm0 = vcmp.ne.s32.totalorder %v198_v3, 0  ;;  %vm201_vm1 = vcmp.ne.s32.totalorder %v199_v4, 0  ;;  %v1336_v34 = vld [vmem:[%s2007_s1 + $0x8] sm:$0xff]  ;;  %v1385_v50 = vld [vmem:[%s2008_s2 + $0x40] sm:$0xff] }
  0x15   : > { %s1393_s28 = sshll.u32 %s192_s27, 4  ;;  %v218_v8 = vsel %vm200_vm0, 1, %v1589_v7  ;;  %v219_v9 = vsel %vm201_vm1, 1, %v1589_v7  ;;  %v1685_v10 = vand.u32 127, %v206_v6  ;;  %v258_v6 = vld [vmem:[%s2007_s1] sm:$0xff]  ;;  %v1341_v7 = vld [vmem:[%s2007_s1 + $0x10] sm:$0xff] }
  0x16   : > { %s195_s5 = scalar_lea.vmem %s2006_s0, %s1393_s28  ;;  %v220_v11 = vperm.slane %v218_v8, 0  ;;  %v221_v12 = vperm.slane %v219_v9, 0  ;;  %v226_v13 = vperm.slane %v218_v8, 1  ;;  %v227_v14 = vperm.slane %v219_v9, 1  ;;  %v1362_v18 = vld [vmem:[%s2008_s2 + $0x8] sm:$0xff] }
  0x17   : > { %v1670_v0 = vld [vmem:[%s195_s5] sm:$0xff]  ;;  %v1672_v1 = vld [vmem:[%s195_s5 + $0x8] sm:$0xff]  ;;  %vm208_vm2 = vcmp.lt.s32.totalorder %v1685_v10, 16  ;;  %vm215_vm3 = vcmp.lt.s32.totalorder %v1685_v10, 112  ;;  %v246_v38 = vperm.slane %v218_v8, 2  ;;  %v247_v39 = vperm.slane %v219_v9, 2 }
  0x18   : > { %v1439_v2 = vpack.i.bf16 %v1672_v1, %v1670_v0  ;;  %vm1689_vm4 = vcmp.eq.s32.totalorder %v220_v11, 1  ;;  %vm1693_vm5 = vcmp.eq.s32.totalorder %v221_v12, 1  ;;  %vm1697_vm6 = vcmp.eq.s32.totalorder %v226_v13, 1 }
  0x19   : > { %vm1701_vm7 = vcmp.eq.s32.totalorder %v227_v14, 1  ;;  %v252_v40 = vperm.slane %v218_v8, 3  ;;  %v253_v41 = vperm.slane %v219_v9, 3  ;;  %vm243_vm9 = vcmp.lt.s32.totalorder %v1685_v10, 127 }
  0x1a   : > { %1440 = vrot.lane.b32.xlu0 %v1439_v2, %s1587_s6  ;;  %1460 = vrot.lane.b32.xlu2 %v1439_v2, %s1590_s12  ;;  %vm236_vm10 = vcmp.lt.s32.totalorder %v1685_v10, 1  ;;  %vm1739_vm11 = vcmp.eq.s32.totalorder %v246_v38, 1  ;;  %vm1743_vm12 = vcmp.eq.s32.totalorder %v247_v39, 1  ;;  %v1379_v10 = vld [vmem:[%s2008_s2 + $0x30] sm:$0xff] }
  0x1b   : > { %vm1747_vm13 = vcmp.eq.s32.totalorder %v252_v40, 1  ;;  %vm1751_vm14 = vcmp.eq.s32.totalorder %v253_v41, 1 }
  0x22   : > { %1445 = vrot.lane.b32.xlu0 %v1439_v2, %s1588_s7  ;;  %1465 = vrot.lane.b32.xlu2 %v1439_v2, %s1591_s13 }
  0x74   : > { %v1461_v35 = vpop.permute.xlu2 %1460 }
  0x75   : > { %v1463_v42 = vunpack.i.h.bf16 %v1461_v35  ;;  %v1462_v43 = vunpack.i.l.bf16 %v1461_v35  ;;  %v1353_v35 = vld [vmem:[%s2007_s1 + $0x30] sm:$0xff] }
  0x77   : > { %v400_v55 = vsel %vm236_vm10, %v1463_v42, %v1462_v43  ;;  %v399_v57 = vsel %vm236_vm10, %v1462_v43, %v1463_v42 }
  0x7c   : > { %v1466_v37 = vpop.permute.xlu2 %1465 }
  0x7d   : > { %v1468_v44 = vunpack.i.h.bf16 %v1466_v37  ;;  %v1467_v45 = vunpack.i.l.bf16 %v1466_v37 }
  0x7f   : > { %v405_v56 = vsel %vm243_vm9, %v1467_v45, %v1468_v44  ;;  %v406_v58 = vsel %vm243_vm9, %v1468_v44, %v1467_v45 }
  0x80   : > { %v407_v11 = vsel %vm1739_vm11, %v405_v56, %v400_v55  ;;  %v408_v12 = vsel %vm1743_vm12, %v406_v58, %v399_v57  ;;  %v409_v14 = vsel %vm1747_vm13, %v400_v55, %v405_v56 }
  0x8c   : > { %v1441_v5 = vpop.permute.xlu0 %1440 }
  0x8d   : > { %v1443_v15 = vunpack.i.h.bf16 %v1441_v5  ;;  %v1442_v16 = vunpack.i.l.bf16 %v1441_v5 }
  0x8f   : > { %v210_v24 = vsel %vm208_vm2, %v1443_v15, %v1442_v16  ;;  %v209_v26 = vsel %vm208_vm2, %v1442_v16, %v1443_v15  ;;  %v410_v15 = vsel %vm1751_vm14, %v399_v57, %v406_v58 }
  0x94   : > { %v1446_v17 = vpop.permute.xlu0 %1445 }
  0x95   : > { %v1448_v20 = vunpack.i.h.bf16 %v1446_v17  ;;  %v1447_v21 = vunpack.i.l.bf16 %v1446_v17 }
  0x97   : > { %v216_v25 = vsel %vm215_vm3, %v1447_v21, %v1448_v20  ;;  %v217_v27 = vsel %vm215_vm3, %v1448_v20, %v1447_v21 }
  0x98   : > { %v224_v28 = vsel %vm1689_vm4, %v216_v25, %v210_v24  ;;  %v225_v29 = vsel %vm1693_vm5, %v217_v27, %v209_v26  ;;  %v1720_v30 = vsel %vm1697_vm6, %v210_v24, %v216_v25  ;;  %v1724_v31 = vsel %vm1701_vm7, %v209_v26, %v217_v27 }
  0x99   : > { %280 = vmatpush.msra.mxu0 %v224_v28  ;;  %300 = vmatpush.msra.mxu1 %v225_v29  ;;  %v1469_v32 = vpack.i.bf16 %v1724_v31, %v1720_v30  ;;  %v1449_v33 = vpack.i.bf16 %v225_v29, %v224_v28  ;;  %v1344_v28 = vld [vmem:[%s2007_s1 + $0x18] sm:$0xff]  ;;  %v1347_v29 = vld [vmem:[%s2007_s1 + $0x20] sm:$0xff] }
  0x9a   : > { %1337 = vmatmul.msk.f32.vlgmr.msra.gmra.mxu0 %vm261_vm8, %v1336_v34  ;;  %1338 = vmatmul.msk.f32.vlgmr.msra.gmra.mxu1 %vm261_vm8, %v1336_v34  ;;  %v1350_v34 = vld [vmem:[%s2007_s1 + $0x28] sm:$0xff] }
  0x9b   : > { %1470 = vrot.lane.b32.xlu0 %v1469_v32, %s1590_s12  ;;  %1450 = vrot.lane.b32.xlu1 %v1449_v33, %s1590_s12 }
  0xa3   : > { %1455 = vrot.lane.b32.xlu1 %v1449_v33, %s1591_s13 }
  0xab   : > { %1475 = vrot.lane.b32.xlu1 %v1469_v32, %s1591_s13 }
 0x10d   : > { %v1451_v36 = vpop.permute.xlu1 %1450  ;;  %v1471_v59 = vpop.permute.xlu0 %1470 }
 0x10e   : > { %v1453_v46 = vunpack.i.h.bf16 %v1451_v36  ;;  %v1452_v47 = vunpack.i.l.bf16 %v1451_v36  ;;  %v1473_v8 = vunpack.i.h.bf16 %v1471_v59  ;;  %v1472_v9 = vunpack.i.l.bf16 %v1471_v59 }
 0x110   : > { %v238_v60 = vsel %vm236_vm10, %v1453_v46, %v1452_v47  ;;  %v237_v62 = vsel %vm236_vm10, %v1452_v47, %v1453_v46  ;;  %v557_v20 = vsel %vm236_vm10, %v1473_v8, %v1472_v9  ;;  %v556_v24 = vsel %vm236_vm10, %v1472_v9, %v1473_v8 }
 0x115   : > { %v1456_v48 = vpop.permute.xlu1 %1455 }
 0x116   : > { %v1458_v51 = vunpack.i.h.bf16 %v1456_v48  ;;  %v1457_v52 = vunpack.i.l.bf16 %v1456_v48 }
 0x117   : > { %v282_v36 = vpop.f32.mrf.mxu0  ;;  %v302_v37 = vpop.f32.mrf.mxu1 }
 0x118   : > { %v244_v61 = vsel %vm243_vm9, %v1457_v52, %v1458_v51  ;;  %v245_v63 = vsel %vm243_vm9, %v1458_v51, %v1457_v52 }
 0x119   : > { %v250_v2 = vsel %vm1739_vm11, %v244_v61, %v238_v60  ;;  %v251_v3 = vsel %vm1743_vm12, %v245_v63, %v237_v62  ;;  %v256_v4 = vsel %vm1747_vm13, %v238_v60, %v244_v61  ;;  %v257_v5 = vsel %vm1751_vm14, %v237_v62, %v245_v63 }
 0x11a   : > { %323 = vmatpush.msra.mxu2 %v250_v2  ;;  %343 = vmatpush.msra.mxu3 %v251_v3 }
 0x11b   : > { %368 = vmatpush.msrb.mxu0 %v256_v4  ;;  %388 = vmatpush.msrb.mxu1 %v257_v5 }
 0x11c   : > { %1339 = vmatmul.msk.f32.vlgmr.msra.gmra.mxu2 %vm261_vm8, %v258_v6  ;;  %1340 = vmatmul.msk.f32.vlgmr.msra.gmra.mxu3 %vm261_vm8, %v258_v6 }
 0x11d   : > { %1342 = vmatmul.msk.f32.vlgmr.msrb.gmra.mxu0 %vm261_vm8, %v1341_v7  ;;  %1343 = vmatmul.msk.f32.vlgmr.msrb.gmra.mxu1 %vm261_vm8, %v1341_v7  ;;  %v1476_v13 = vpop.permute.xlu1 %1475 }
 0x11e   : > { %431 = vmatpush.msrb.mxu2 %v407_v11  ;;  %451 = vmatpush.msrb.mxu3 %v408_v12  ;;  %v1478_v16 = vunpack.i.h.bf16 %v1476_v13  ;;  %v1477_v17 = vunpack.i.l.bf16 %v1476_v13 }
 0x11f   : > { %478 = vmatpush.msra.mxu0 %v1670_v0  ;;  %498 = vmatpush.msra.mxu1 %v1672_v1 }
 0x120   : > { %525 = vmatpush.msra.mxu2 %v409_v14  ;;  %545 = vmatpush.msra.mxu3 %v410_v15  ;;  %v562_v21 = vsel %vm243_vm9, %v1477_v17, %v1478_v16  ;;  %v563_v25 = vsel %vm243_vm9, %v1478_v16, %v1477_v17 }
 0x121   : > { %v564_v26 = vsel %vm1739_vm11, %v562_v21, %v557_v20  ;;  %v565_v27 = vsel %vm1743_vm12, %v563_v25, %v556_v24  ;;  %v566_v32 = vsel %vm1747_vm13, %v557_v20, %v562_v21  ;;  %v567_v33 = vsel %vm1751_vm14, %v556_v24, %v563_v25 }
 0x122   : > { %588 = vmatpush.msrb.mxu0 %v564_v26  ;;  %608 = vmatpush.msrb.mxu1 %v565_v27 }
 0x124   : > { %1345 = vmatmul.msk.f32.vlgmr.msrb.gmra.mxu2 %vm261_vm8, %v1344_v28  ;;  %1346 = vmatmul.msk.f32.vlgmr.msrb.gmra.mxu3 %vm261_vm8, %v1344_v28 }
 0x125   : > { %1348 = vmatmul.msk.f32.vlgmr.msra.gmra.mxu0 %vm261_vm8, %v1347_v29  ;;  %1349 = vmatmul.msk.f32.vlgmr.msra.gmra.mxu1 %vm261_vm8, %v1347_v29 }
 0x126   : > { %635 = vmatpush.msrb.mxu2 %v1720_v30  ;;  %655 = vmatpush.msrb.mxu3 %v1724_v31  ;;  %v1356_v30 = vld [vmem:[%s2007_s1 + $0x38] sm:$0xff]  ;;  %v1359_v31 = vld [vmem:[%s2007_s1 + $0x40] sm:$0xff] }
 0x127   : > { %682 = vmatpush.msra.mxu0 %v566_v32  ;;  %702 = vmatpush.msra.mxu1 %v567_v33 }
 0x12c   : > { %1351 = vmatmul.msk.f32.vlgmr.msra.gmra.mxu2 %vm261_vm8, %v1350_v34  ;;  %1352 = vmatmul.msk.f32.vlgmr.msra.gmra.mxu3 %vm261_vm8, %v1350_v34 }
 0x12d   : > { %1354 = vmatmul.msk.f32.vlgmr.msrb.gmra.mxu0 %vm261_vm8, %v1353_v35  ;;  %1355 = vmatmul.msk.f32.vlgmr.msrb.gmra.mxu1 %vm261_vm8, %v1353_v35 }
 0x134   : > { %1357 = vmatmul.msk.f32.vlgmr.msrb.gmra.mxu2 %vm261_vm8, %v1356_v30  ;;  %1358 = vmatmul.msk.f32.vlgmr.msrb.gmra.mxu3 %vm261_vm8, %v1356_v30 }
 0x135   : > { %1360 = vmatmul.msk.f32.vlgmr.msra.gmra.mxu0 %vm261_vm8, %v1359_v31  ;;  %1361 = vmatmul.msk.f32.vlgmr.msra.gmra.mxu1 %vm261_vm8, %v1359_v31 }
 0x19a   : > { %v370_v38 = vpop.f32.mrf.mxu0  ;;  %v390_v39 = vpop.f32.mrf.mxu1 }
 0x19f   : > { %v325_v40 = vpop.f32.mrf.mxu2  ;;  %v345_v41 = vpop.f32.mrf.mxu3 }
 0x1a0   : > { %v326_v44 = vadd.f32 %v325_v40, %v282_v36  ;;  %v346_v45 = vadd.f32 %v345_v41, %v302_v37 }
 0x1a2   : > { %v480_v42 = vpop.f32.mrf.mxu0  ;;  %v500_v43 = vpop.f32.mrf.mxu1  ;;  %v393_v48 = vadd.f32 %v370_v38, %v326_v44  ;;  %v394_v51 = vadd.f32 %v390_v39, %v346_v45 }
 0x1a7   : > { %v433_v46 = vpop.f32.mrf.mxu2  ;;  %v453_v47 = vpop.f32.mrf.mxu3 }
 0x1a8   : > { %v456_v52 = vadd.f32 %v433_v46, %v393_v48  ;;  %v457_v55 = vadd.f32 %v453_v47, %v394_v51 }
 0x1aa   : > { %v590_v56 = vpop.f32.mrf.mxu0  ;;  %v610_v57 = vpop.f32.mrf.mxu1  ;;  %v503_v60 = vadd.f32 %v480_v42, %v456_v52  ;;  %v504_v61 = vadd.f32 %v500_v43, %v457_v55 }
 0x1af   : > { %v527_v58 = vpop.f32.mrf.mxu2  ;;  %v547_v59 = vpop.f32.mrf.mxu3 }
 0x1b0   : > { %v550_v62 = vadd.f32 %v527_v58, %v503_v60  ;;  %v551_v63 = vadd.f32 %v547_v59, %v504_v61 }
 0x1b2   : > { %v613_v2 = vadd.f32 %v590_v56, %v550_v62  ;;  %v614_v3 = vadd.f32 %v610_v57, %v551_v63  ;;  %v684_v4 = vpop.f32.mrf.mxu0  ;;  %v704_v5 = vpop.f32.mrf.mxu1 }
 0x1b7   : > { %v637_v6 = vpop.f32.mrf.mxu2  ;;  %v657_v7 = vpop.f32.mrf.mxu3 }
 0x1b8   : > { %v660_v8 = vadd.f32 %v637_v6, %v613_v2  ;;  %v661_v9 = vadd.f32 %v657_v7, %v614_v3 }
 0x1ba   : > { %v707_v11 = vadd.f32 %v684_v4, %v660_v8  ;;  %v708_v12 = vadd.f32 %v704_v5, %v661_v9 }
 0x1bc   : > { %v709_v13 = vadd.f32 %v708_v12, %v707_v11  ;;  %v712_v14 = vmul.f32 %v707_v11, %v707_v11  ;;  %v713_v15 = vmul.f32 %v708_v12, %v708_v12 }
 0x1be   : > { %710 = vadd.xlane.f32.xlu2 %v709_v13  ;;  %v714_v16 = vadd.f32 %v713_v15, %v712_v14  ;;  %v771_v14 = vld [vmem:[%s2008_s2] sm:$0xff]  ;;  %v1367_v15 = vld [vmem:[%s2008_s2 + $0x10] sm:$0xff] }
 0x1c0   : > { %715 = vadd.xlane.f32.xlu0 %v714_v16 }
 0x231   : > { %v711_v17 = vpop.xlane.xlu2 %710 }
 0x232   : > { %v717_v20 = vmul.f32 0.00390625, %v711_v17 }
 0x233   : > { %v716_v21 = vpop.xlane.xlu0 %715 }
 0x234   : > { %v718_v24 = vmul.f32 0.00390625, %v716_v21  ;;  %v719_v25 = vmul.f32 %v717_v20, %v717_v20  ;;  %v722_v31 = vsub.f32 %v707_v11, %v717_v20  ;;  %v723_v36 = vsub.f32 %v708_v12, %v717_v20 }
 0x236   : > { %v720_v26 = vsub.f32 %v718_v24, %v719_v25 }
 0x238   : > { %v721_v27 = vmax.f32 %v720_v26, 0.0 }
 0x23a   : > { %v724_v28 = vadd.f32 1e-05, %v721_v27 }
 0x23c   : > { %1519 = vrsqrt.f32 %v724_v28  ;;  %vm731_vm0 = vweird.f32 %v724_v28 }
 0x242   : > { %v1520_v29 = vpop.eup %1519 }
 0x243   : > { %v726_v32 = vmul.f32 %v1520_v29, %v724_v28  ;;  %vm732_vm15 = vweird.f32 %v1520_v29 }
 0x244   : > { %vm733_vm1 = vmor %vm731_vm0, %vm732_vm15 }
 0x245   : > { %v727_v33 = vmul.f32 %v1520_v29, %v726_v32 }
 0x247   : > { %v728_v34 = vmul.f32 0.5, %v727_v33 }
 0x249   : > { %v729_v35 = vsub.f32 1.5, %v728_v34  ;;  %v1370_v34 = vld [vmem:[%s2008_s2 + $0x18] sm:$0xff] }
 0x24b   : > { %v730_v30 = vmul.f32 %v1520_v29, %v729_v35 }
 0x24d   : > { %v734_v37 = vsel %vm733_vm1, %v1520_v29, %v730_v30 }
 0x24e   : > { %v735_v38 = vmul.f32 %v734_v37, %v722_v31  ;;  %v736_v39 = vmul.f32 %v734_v37, %v723_v36  ;;  %v1373_v31 = vld [vmem:[%s2008_s2 + $0x20] sm:$0xff] }
 0x250   : > { %v737_v40 = vmax.f32 %v735_v38, 0.0  ;;  %v738_v41 = vmax.f32 %v736_v39, 0.0 }
 0x252   : > { %v1504_v42 = vpack.i.bf16 %v738_v41, %v737_v40 }
 0x254   : > { %1505 = vrot.lane.b32.xlu2 %v1504_v42, %s1591_s13  ;;  %1480 = vrot.lane.b32.xlu1 %v1504_v42, %s1587_s6 }
 0x25c   : > { %1485 = vrot.lane.b32.xlu1 %v1504_v42, %s1588_s7  ;;  %s188_s7 = sand.u32 1, %s1577_s16  }
 0x2ae   : > { %v1506_v8 = vpop.permute.xlu2 %1505 }
 0x2af   : > { %v1508_v16 = vunpack.i.h.bf16 %v1506_v8  ;;  %v1507_v17 = vunpack.i.l.bf16 %v1506_v8 }
 0x2b1   : > { %v917_v26 = vsel %vm243_vm9, %v1507_v17, %v1508_v16  ;;  %v918_v28 = vsel %vm243_vm9, %v1508_v16, %v1507_v17 }
 0x2c6   : > { %v1481_v43 = vpop.permute.xlu1 %1480 }
 0x2c7   : > { %v1483_v44 = vunpack.i.h.bf16 %v1481_v43  ;;  %v1482_v45 = vunpack.i.l.bf16 %v1481_v43 }
 0x2c9   : > { %v744_v51 = vsel %vm208_vm2, %v1483_v44, %v1482_v45  ;;  %v743_v55 = vsel %vm208_vm2, %v1482_v45, %v1483_v44 }
 0x2ce   : > { %v1486_v46 = vpop.permute.xlu1 %1485 }
 0x2cf   : > { %v1488_v47 = vunpack.i.h.bf16 %v1486_v46  ;;  %v1487_v48 = vunpack.i.l.bf16 %v1486_v46 }
 0x2d1   : > { %v749_v52 = vsel %vm215_vm3, %v1487_v48, %v1488_v47  ;;  %v750_v56 = vsel %vm215_vm3, %v1488_v47, %v1487_v48  ;;  %v1376_v47 = vld [vmem:[%s2008_s2 + $0x28] sm:$0xff] }
 0x2d2   : > { %v751_v57 = vsel %vm1689_vm4, %v749_v52, %v744_v51  ;;  %v752_v58 = vsel %vm1693_vm5, %v750_v56, %v743_v55  ;;  %v1864_v59 = vsel %vm1697_vm6, %v744_v51, %v749_v52  ;;  %v1868_v60 = vsel %vm1701_vm7, %v743_v55, %v750_v56 }
 0x2d3   : > { %792 = vmatpush.msra.mxu2 %v751_v57  ;;  %812 = vmatpush.msra.mxu3 %v752_v58  ;;  %v1514_v61 = vpack.i.bf16 %v1868_v60, %v1864_v59  ;;  %v1489_v62 = vpack.i.bf16 %v752_v58, %v751_v57 }
 0x2d4   : > { %1363 = vmatmul.msk.f32.vlgmr.msra.gmra.mxu2 %vm261_vm8, %v1362_v18  ;;  %1364 = vmatmul.msk.f32.vlgmr.msra.gmra.mxu3 %vm261_vm8, %v1362_v18 }
 0x2d5   : > { %1515 = vrot.lane.b32.xlu0 %v1514_v61, %s1591_s13  ;;  %1490 = vrot.lane.b32.xlu1 %v1489_v62, %s1590_s12 }
 0x2dd   : > { %1495 = vrot.lane.b32.xlu1 %v1489_v62, %s1591_s13  ;;  %s1394_s13 = sshll.u32 %s1638_s19, 4  ;;  %s1254_s19 = scalar_lea.sflag [#allocation3], %s188_s7 }
 0x2de   : > { %s1265_s30 = scalar_lea.hbm %s2010_s4, %s1394_s13 }
 0x2df   : > { %s1269_s9 = sshll.u32 %s1265_s30, 4  ;;  %s1270_s9 = int_to_ptr.hbm [resolvable:$true] %s1269_s9 }
 0x2e0   : > { %s1537_s10 = sshra.s32 %s1270_s9, 4  ;;  %s1538_s10 = int_to_ptr.hbm [resolvable:$true] %s1537_s10 }
 0x2e1   : > { %s1539_s11 = scalar_lea.hbm %s1538_s10, 16  ;;  %p1544_p0 = scmp.lt.s32.totalorder %s1538_s10, %s2010_s4 }
 0x2e2   : > { %p1540_p11 = scmp.ne.s32.totalorder %s1538_s10, %s1539_s11  ;;  %p1545_p1 = scmp.lt.s32.totalorder %s1543_s22, %s1539_s11 }
 0x2e4   : > { %p1541_p12 = pnand %p1540_p11, %p1655_p5  ;;  %p1546_p2 = por %p1545_p1, %p1544_p0 }
 0x2e5   : > { %1500 = vrot.lane.b32.xlu1 %v1504_v42, %s1590_s12 }
 0x2e6   : > { %p1542_p13 = pneg %p1541_p12 }
 0x2e8   : > { %p1547_p3 = pnand %p1546_p2, %p1542_p13 }
 0x2ed   : > { %1510 = vrot.lane.b32.xlu1 %v1514_v61, %s1590_s12  ;;  %s1333_s12 = sshll.u32 %s188_s7, 4 }
 0x2ee   : > { %s190_s5 = scalar_lea.vmem [#allocation2], %s1333_s12 }
 0x2ef   : > { %s1267_s8 = sshll.u32 %s190_s5, 4  ;;  %s1268_s8 = int_to_ptr.vmem [resolvable:$true] %s1267_s8 }
 0x347   : > { %v1491_v19 = vpop.permute.xlu1 %1490  ;;  %v1516_v29 = vpop.permute.xlu0 %1515 }
 0x348   : > { %v1493_v22 = vunpack.i.h.bf16 %v1491_v19  ;;  %v1492_v23 = vunpack.i.l.bf16 %v1491_v19  ;;  %v1518_v36 = vunpack.i.h.bf16 %v1516_v29  ;;  %v1517_v37 = vunpack.i.l.bf16 %v1516_v29 }
 0x34a   : > { %v760_v4 = vsel %vm236_vm10, %v1493_v22, %v1492_v23  ;;  %v759_v6 = vsel %vm236_vm10, %v1492_v23, %v1493_v22  ;;  %v1075_v42 = vsel %vm243_vm9, %v1518_v36, %v1517_v37 }
 0x34f   : > { %v1496_v63 = vpop.permute.xlu1 %1495 }
 0x350   : > { %v1498_v2 = vunpack.i.h.bf16 %v1496_v63  ;;  %v1497_v3 = vunpack.i.l.bf16 %v1496_v63 }
 0x352   : > { %v765_v5 = vsel %vm243_vm9, %v1497_v3, %v1498_v2  ;;  %v766_v7 = vsel %vm243_vm9, %v1498_v2, %v1497_v3 }
 0x353   : > { %v767_v9 = vsel %vm1739_vm11, %v765_v5, %v760_v4  ;;  %v768_v11 = vsel %vm1743_vm12, %v766_v7, %v759_v6  ;;  %v769_v12 = vsel %vm1747_vm13, %v760_v4, %v765_v5  ;;  %v770_v13 = vsel %vm1751_vm14, %v759_v6, %v766_v7 }
 0x354   : > { %835 = vmatpush.msrb.mxu0 %v767_v9  ;;  %855 = vmatpush.msrb.mxu1 %v768_v11 }
 0x355   : > { %880 = vmatpush.msrb.mxu2 %v769_v12  ;;  %900 = vmatpush.msrb.mxu3 %v770_v13 }
 0x356   : > { %1365 = vmatmul.msk.f32.vlgmr.msrb.gmra.mxu0 %vm261_vm8, %v771_v14  ;;  %1366 = vmatmul.msk.f32.vlgmr.msrb.gmra.mxu1 %vm261_vm8, %v771_v14 }
 0x357   : > { %1368 = vmatmul.msk.f32.vlgmr.msrb.gmra.mxu2 %vm261_vm8, %v1367_v15  ;;  %1369 = vmatmul.msk.f32.vlgmr.msrb.gmra.mxu3 %vm261_vm8, %v1367_v15  ;;  %v1501_v20 = vpop.permute.xlu1 %1500  ;;  %v794_v53 = vpop.f32.mrf.mxu2 }
 0x358   : > { %990 = vmatpush.msra.mxu2 %v737_v40  ;;  %1010 = vmatpush.msra.mxu3 %v738_v41  ;;  %v1503_v21 = vunpack.i.h.bf16 %v1501_v20  ;;  %v1502_v24 = vunpack.i.l.bf16 %v1501_v20  ;;  %v1074_v41 = vsel %vm243_vm9, %v1517_v37, %v1518_v36  ;;  %v814_v54 = vpop.f32.mrf.mxu3 }
 0x35a   : > { %v912_v25 = vsel %vm236_vm10, %v1503_v21, %v1502_v24  ;;  %v911_v27 = vsel %vm236_vm10, %v1502_v24, %v1503_v21 }
 0x35b   : > { %v919_v32 = vsel %vm1739_vm11, %v917_v26, %v912_v25  ;;  %v920_v33 = vsel %vm1743_vm12, %v918_v28, %v911_v27  ;;  %v921_v35 = vsel %vm1747_vm13, %v912_v25, %v917_v26  ;;  %v922_v30 = vsel %vm1751_vm14, %v911_v27, %v918_v28 }
 0x35c   : > { %943 = vmatpush.msra.mxu0 %v919_v32  ;;  %963 = vmatpush.msra.mxu1 %v920_v33 }
 0x35e   : > { %1037 = vmatpush.msrb.mxu0 %v921_v35  ;;  %1057 = vmatpush.msrb.mxu1 %v922_v30 }
 0x35f   : > { %1371 = vmatmul.msk.f32.vlgmr.msra.gmra.mxu0 %vm261_vm8, %v1370_v34  ;;  %1372 = vmatmul.msk.f32.vlgmr.msra.gmra.mxu1 %vm261_vm8, %v1370_v34  ;;  %v1511_v38 = vpop.permute.xlu1 %1510 }
 0x360   : > { %1374 = vmatmul.msk.f32.vlgmr.msra.gmra.mxu2 %vm261_vm8, %v1373_v31  ;;  %1375 = vmatmul.msk.f32.vlgmr.msra.gmra.mxu3 %vm261_vm8, %v1373_v31  ;;  %v1513_v39 = vunpack.i.h.bf16 %v1511_v38  ;;  %v1512_v40 = vunpack.i.l.bf16 %v1511_v38 }
 0x361   : > { %1147 = vmatpush.msra.mxu0 %v1864_v59  ;;  %1167 = vmatpush.msra.mxu1 %v1868_v60 }
 0x362   : > { %v1069_v43 = vsel %vm236_vm10, %v1513_v39, %v1512_v40  ;;  %v1068_v44 = vsel %vm236_vm10, %v1512_v40, %v1513_v39 }
 0x363   : > { %v1076_v45 = vsel %vm1739_vm11, %v1074_v41, %v1069_v43  ;;  %v1077_v46 = vsel %vm1743_vm12, %v1075_v42, %v1068_v44  ;;  %v1078_v48 = vsel %vm1747_vm13, %v1069_v43, %v1074_v41  ;;  %v1079_v51 = vsel %vm1751_vm14, %v1068_v44, %v1075_v42 }
 0x364   : > { %1100 = vmatpush.msrb.mxu2 %v1076_v45  ;;  %1120 = vmatpush.msrb.mxu3 %v1077_v46 }
 0x366   : > { %1194 = vmatpush.msra.mxu2 %v1078_v48  ;;  %1214 = vmatpush.msra.mxu3 %v1079_v51 }
 0x367   : > { %1377 = vmatmul.msk.f32.vlgmr.msrb.gmra.mxu0 %vm261_vm8, %v1376_v47  ;;  %1378 = vmatmul.msk.f32.vlgmr.msrb.gmra.mxu1 %vm261_vm8, %v1376_v47 }
 0x368   : > { %1380 = vmatmul.msk.f32.vlgmr.msrb.gmra.mxu2 %vm261_vm8, %v1379_v10  ;;  %1381 = vmatmul.msk.f32.vlgmr.msrb.gmra.mxu3 %vm261_vm8, %v1379_v10 }
 0x36f   : > { %1383 = vmatmul.msk.f32.vlgmr.msra.gmra.mxu0 %vm261_vm8, %v1382_v49  ;;  %1384 = vmatmul.msk.f32.vlgmr.msra.gmra.mxu1 %vm261_vm8, %v1382_v49 }
 0x370   : > { %1386 = vmatmul.msk.f32.vlgmr.msra.gmra.mxu2 %vm261_vm8, %v1385_v50  ;;  %1387 = vmatmul.msk.f32.vlgmr.msra.gmra.mxu3 %vm261_vm8, %v1385_v50 }
 0x3d3   : > { %v837_v52 = vpop.f32.mrf.mxu0  ;;  %v857_v55 = vpop.f32.mrf.mxu1 }
 0x3d4   : > { %v838_v60 = vadd.f32 %v837_v52, %v794_v53  ;;  %v858_v61 = vadd.f32 %v857_v55, %v814_v54 }
 0x3da   : > { %v882_v56 = vpop.f32.mrf.mxu2  ;;  %v902_v57 = vpop.f32.mrf.mxu3 }
 0x3db   : > { %v905_v62 = vadd.f32 %v882_v56, %v838_v60  ;;  %v906_v18 = vadd.f32 %v902_v57, %v858_v61 }
 0x3dc   : > { %v945_v58 = vpop.f32.mrf.mxu0  ;;  %v965_v59 = vpop.f32.mrf.mxu1 }
 0x3dd   : > { %v968_v2 = vadd.f32 %v945_v58, %v905_v62  ;;  %v969_v3 = vadd.f32 %v965_v59, %v906_v18 }
 0x3e3   : > { %v992_v19 = vpop.f32.mrf.mxu2  ;;  %v1012_v22 = vpop.f32.mrf.mxu3 }
 0x3e4   : > { %v1039_v23 = vpop.f32.mrf.mxu0  ;;  %v1059_v63 = vpop.f32.mrf.mxu1  ;;  %v1015_v4 = vadd.f32 %v992_v19, %v968_v2  ;;  %v1016_v5 = vadd.f32 %v1012_v22, %v969_v3 }
 0x3e6   : > { %v1062_v8 = vadd.f32 %v1039_v23, %v1015_v4  ;;  %v1063_v9 = vadd.f32 %v1059_v63, %v1016_v5 }
 0x3eb   : > { %v1102_v6 = vpop.f32.mrf.mxu2  ;;  %v1122_v7 = vpop.f32.mrf.mxu3 }
 0x3ec   : > { %v1125_v11 = vadd.f32 %v1102_v6, %v1062_v8  ;;  %v1126_v12 = vadd.f32 %v1122_v7, %v1063_v9  ;;  %v1149_v13 = vpop.f32.mrf.mxu0  ;;  %v1169_v14 = vpop.f32.mrf.mxu1 }
 0x3ee   : > { %v1172_v15 = vadd.f32 %v1149_v13, %v1125_v11  ;;  %v1173_v16 = vadd.f32 %v1169_v14, %v1126_v12 }
 0x3f3   : > { %v1196_v17 = vpop.f32.mrf.mxu2  ;;  %v1216_v20 = vpop.f32.mrf.mxu3 }
 0x3f4   : > { %v1219_v21 = vadd.f32 %v1196_v17, %v1172_v15  ;;  %v1220_v24 = vadd.f32 %v1216_v20, %v1173_v16 }
 0x3f6   : > { %v1221_v25 = vadd.f32 %v1220_v24, %v1219_v21  ;;  %v1224_v26 = vmul.f32 %v1219_v21, %v1219_v21  ;;  %v1225_v27 = vmul.f32 %v1220_v24, %v1220_v24 }
 0x3f8   : > { %1222 = vadd.xlane.f32.xlu1 %v1221_v25  ;;  %v1226_v28 = vadd.f32 %v1225_v27, %v1224_v26 }
 0x3fa   : > { %1227 = vadd.xlane.f32.xlu2 %v1226_v28 }
 0x46b   : > { %v1223_v29 = vpop.xlane.xlu1 %1222 }
 0x46c   : > { %v1229_v32 = vmul.f32 0.00390625, %v1223_v29 }
 0x46d   : > { %v1228_v33 = vpop.xlane.xlu2 %1227 }
 0x46e   : > { %v1230_v34 = vmul.f32 0.00390625, %v1228_v33  ;;  %v1231_v35 = vmul.f32 %v1229_v32, %v1229_v32  ;;  %v1234_v43 = vsub.f32 %v1219_v21, %v1229_v32  ;;  %v1235_v44 = vsub.f32 %v1220_v24, %v1229_v32 }
 0x470   : > { %v1232_v30 = vsub.f32 %v1230_v34, %v1231_v35 }
 0x472   : > { %v1233_v31 = vmax.f32 %v1232_v30, 0.0 }
 0x474   : > { %v1236_v36 = vadd.f32 1e-05, %v1233_v31 }
 0x476   : > { %1521 = vrsqrt.f32 %v1236_v36  ;;  %vm1243_vm3 = vweird.f32 %v1236_v36 }
 0x47c   : > { %v1522_v37 = vpop.eup %1521 }
 0x47d   : > { %v1238_v38 = vmul.f32 %v1522_v37, %v1236_v36  ;;  %vm1244_vm2 = vweird.f32 %v1522_v37 }
 0x47e   : > { %vm1245_vm4 = vmor %vm1243_vm3, %vm1244_vm2 }
 0x47f   : > { %v1239_v39 = vmul.f32 %v1522_v37, %v1238_v38 }
 0x481   : > { %v1240_v40 = vmul.f32 0.5, %v1239_v39 }
 0x483   : > { %v1241_v41 = vsub.f32 1.5, %v1240_v40 }
 0x485   : > { %v1242_v42 = vmul.f32 %v1522_v37, %v1241_v41 }
 0x487   : > { %v1246_v45 = vsel %vm1245_vm4, %v1522_v37, %v1242_v42 }
 0x488   : > { %v1247_v46 = vmul.f32 %v1246_v45, %v1234_v43  ;;  %v1248_v47 = vmul.f32 %v1246_v45, %v1235_v44 }
 0x48a   : > { %v1249_v48 = vadd.f32 %v1247_v46, %v1670_v0  ;;  %v1250_v51 = vadd.f32 %v1248_v47, %v1672_v1 }
 0x48c   : > { %1251 = vst [vmem:[%s190_s5] sm:$0xff] %v1249_v48 }
 0x48d   : > { %1252 = vst [vmem:[%s190_s5 + $0x8] sm:$0xff] %v1250_v51 }
 0x48e   : > { %1550 = shalt.err (!%p1547_p3)
}
 0x48f   : > { %1395 = dma.vmem_to_hbm [thread:$0]  (%p1655_p5), %s1268_s8, 256, %s1270_s9, %s1254_s19  }
 0x490 PF: > { %p1401_p4 = scmp.ge.s32.totalorder %s1585_s18, 2  ;;  %s1281_s6 = sand.u32 1, %s1573_s15  }
 0x491   : > { %s1282_s7 = scalar_lea.sflag [#allocation3], %s1281_s6 }
 0x492   : > { %p1398_p7 = pnand %p1401_p4, %p1659_p6 }
 0x494   : > { %p1399_p8 = pneg %p1398_p7 }
 0x496   : > { %1568 = dma.done.wait (%p1399_p8), %s1282_s7, 256  }
 0x497   : > { %1570 = vsyncadd (%p1399_p8), %s1282_s7, 4294967040  ;;  %p14_p9 = scmp.ge.s32.totalorder %s1642_s21, 4   ;;  %s2029_s15 = smov %s1577_s16 }
 0x498   : > { %s2030_s16 = smov %s1581_s17  ;;  %s2031_s17 = smov %s1653_s24 }
 0x499   : > { %s2032_s18 = smov %s1642_s21  ;;  %16 = sbr.rel (!%p14_p9) target bundleno = 3 (0x3), region = 87 }
 0x49e   :  { %1288 = vsyncpa [#allocation3], 1 }
 0x49f   :  { %1290 = vsyncpa [#allocation3 + $0x1], 1 }

// kernel: tpu_custom_call.1
= control target key start
LH: loop header
LB: loop body
LE: loop exit
PB: predicated region body
PF: predicated region fallthrough
CT: control target
= control target key end

     0   :  { %9 = vsyncpa [#allocation3], 0  ;;  %s2006_s0 = inlined_call_operand.vmem [shape: f32[2,8,256], index: 0, kind: input, shape index: {}]   ;;  %s2007_s1 = inlined_call_operand.vmem [shape: f32[9,8,8], index: 1, kind: input, shape index: {}]   ;;  %s2008_s2 = inlined_call_operand.vmem [shape: f32[9,8,8], index: 2, kind: input, shape index: {}]   ;;  %s2009_s3 = inlined_call_operand.vmem [shape: s32[8,256], index: 3, kind: input, shape index: {}]   ;;  %s2010_s4 = inlined_call_operand.hbm [shape: f32[2,8,256], index: 4, kind: output, shape index: {}]  }
   0x1   :  { %11 = vsyncpa [#allocation3 + $0x1], 0  ;;  %s1617_s15 = smov 0   ;;  %s1619_s16 = smov 0  }
   0x2   :  { %s1621_s17 = smov 0   ;;  %s1623_s18 = smov 0  }
   0x3 LB: > { %s1638_s19 = sadd.s32 4294967295, %s1585_s18   ;;  %s1329_s20 = sadd.s32 4294967294, %s1585_s18   ;;  %s1585_s18 = sphi %s1623_s18, %s2032_s18   ;;  %s1581_s17 = sphi %s1621_s17, %s2031_s17   ;;  %s1577_s16 = sphi %s1619_s16, %s2030_s16   ;;  %s1573_s15 = sphi %s1617_s15, %s2029_s15  }
   0x4   : > { %s1642_s21 = sadd.s32 1, %s1585_s18   ;;  %s113_s22 = sadd.s32 1, %s1581_s17 }
   0x5   : > { %s110_s23 = ssub.s32 %s1585_s18, %s1642_s21  ;;  %p123_p0 = scmp.ne.s32.totalorder %s1581_s17, %s1577_s16 }
   0x6   : > { %p111_p1 = scmp.eq.s32.totalorder %s110_s23, 0  ;;  %p124_p2 = scmp.eq.s32.totalorder %s1638_s19, 1 }
   0x7   : > { %p129_p3 = scmp.ne.s32.totalorder %s1577_s16, %s1573_s15  ;;  %p130_p4 = scmp.eq.s32.totalorder %s1329_s20, 1 }
   0x8   : > { %s1653_s24 = scalar_select %p111_p1, %s1581_s17, %s113_s22  }
   0x9   : > { %p1655_p5 = por %p124_p2, %p123_p0  ;;  %p1659_p6 = por %p130_p4, %p129_p3 }
   0xa   : > { %p1332_p7 = scmp.ge.s32.totalorder %s1585_s18, 1  ;;  %p165_p8 = scmp.lt.s32.totalorder %s1585_s18, 3 }
   0xc   : > { %p166_p9 = pnand %p1332_p7, %p165_p8 }
   0xd   : > { %p191_p10 = scmp.lt.s32.totalorder (!%p166_p9), %s1638_s19, 1  ;;  %s1587_s6 = smov (!%p166_p9), 16  }
   0xe   : > { %169 = sbr.rel (%p166_p9) target bundleno = 1168 (0x490), region = 36  ;;  %s1588_s7 = smov (!%p166_p9), 112  }
   0xf   : > { %s1590_s12 = smov (!%p166_p9), 1   ;;  %s1591_s13 = smov (!%p166_p9), 127  }
  0x10   : > { %s1543_s22 = scalar_lea.hbm (!%p166_p9), %s2010_s4, 32 }
  0x13   : > { %s192_s27 = scalar_select %p191_p10, %s1638_s19, 1  ;;  %v198_v3 = vld [vmem:[%s2009_s3] sm:$0xff]  ;;  %v199_v4 = vld [vmem:[%s2009_s3 + $0x8] sm:$0xff]  ;;  %v206_v6 = vlaneseq  ;;  %v1589_v7 = vmov 0   ;;  %vm261_vm8 = vcmask 64512   ;;  %v1382_v49 = vld [vmem:[%s2008_s2 + $0x38] sm:$0xff] }
  0x14   : > { %vm200_vm0 = vcmp.ne.s32.totalorder %v198_v3, 0  ;;  %vm201_vm1 = vcmp.ne.s32.totalorder %v199_v4, 0  ;;  %v1336_v34 = vld [vmem:[%s2007_s1 + $0x8] sm:$0xff]  ;;  %v1385_v50 = vld [vmem:[%s2008_s2 + $0x40] sm:$0xff] }
  0x15   : > { %s1393_s28 = sshll.u32 %s192_s27, 4  ;;  %v218_v8 = vsel %vm200_vm0, 1, %v1589_v7  ;;  %v219_v9 = vsel %vm201_vm1, 1, %v1589_v7  ;;  %v1685_v10 = vand.u32 127, %v206_v6  ;;  %v258_v6 = vld [vmem:[%s2007_s1] sm:$0xff]  ;;  %v1341_v7 = vld [vmem:[%s2007_s1 + $0x10] sm:$0xff] }
  0x16   : > { %s195_s5 = scalar_lea.vmem %s2006_s0, %s1393_s28  ;;  %v220_v11 = vperm.slane %v218_v8, 0  ;;  %v221_v12 = vperm.slane %v219_v9, 0  ;;  %v226_v13 = vperm.slane %v218_v8, 1  ;;  %v227_v14 = vperm.slane %v219_v9, 1  ;;  %v1362_v18 = vld [vmem:[%s2008_s2 + $0x8] sm:$0xff] }
  0x17   : > { %v1670_v0 = vld [vmem:[%s195_s5] sm:$0xff]  ;;  %v1672_v1 = vld [vmem:[%s195_s5 + $0x8] sm:$0xff]  ;;  %vm208_vm2 = vcmp.lt.s32.totalorder %v1685_v10, 16  ;;  %vm215_vm3 = vcmp.lt.s32.totalorder %v1685_v10, 112  ;;  %v246_v38 = vperm.slane %v218_v8, 2  ;;  %v247_v39 = vperm.slane %v219_v9, 2 }
  0x18   : > { %v1439_v2 = vpack.i.bf16 %v1672_v1, %v1670_v0  ;;  %vm1689_vm4 = vcmp.eq.s32.totalorder %v220_v11, 1  ;;  %vm1693_vm5 = vcmp.eq.s32.totalorder %v221_v12, 1  ;;  %vm1697_vm6 = vcmp.eq.s32.totalorder %v226_v13, 1 }
  0x19   : > { %vm1701_vm7 = vcmp.eq.s32.totalorder %v227_v14, 1  ;;  %v252_v40 = vperm.slane %v218_v8, 3  ;;  %v253_v41 = vperm.slane %v219_v9, 3  ;;  %vm243_vm9 = vcmp.lt.s32.totalorder %v1685_v10, 127 }
  0x1a   : > { %1440 = vrot.lane.b32.xlu0 %v1439_v2, %s1587_s6  ;;  %1460 = vrot.lane.b32.xlu2 %v1439_v2, %s1590_s12  ;;  %vm236_vm10 = vcmp.lt.s32.totalorder %v1685_v10, 1  ;;  %vm1739_vm11 = vcmp.eq.s32.totalorder %v246_v38, 1  ;;  %vm1743_vm12 = vcmp.eq.s32.totalorder %v247_v39, 1  ;;  %v1379_v10 = vld [vmem:[%s2008_s2 + $0x30] sm:$0xff] }
  0x1b   : > { %vm1747_vm13 = vcmp.eq.s32.totalorder %v252_v40, 1  ;;  %vm1751_vm14 = vcmp.eq.s32.totalorder %v253_v41, 1 }
  0x22   : > { %1445 = vrot.lane.b32.xlu0 %v1439_v2, %s1588_s7  ;;  %1465 = vrot.lane.b32.xlu2 %v1439_v2, %s1591_s13 }
  0x74   : > { %v1461_v35 = vpop.permute.xlu2 %1460 }
  0x75   : > { %v1463_v42 = vunpack.i.h.bf16 %v1461_v35  ;;  %v1462_v43 = vunpack.i.l.bf16 %v1461_v35  ;;  %v1353_v35 = vld [vmem:[%s2007_s1 + $0x30] sm:$0xff] }
  0x77   : > { %v400_v55 = vsel %vm236_vm10, %v1463_v42, %v1462_v43  ;;  %v399_v57 = vsel %vm236_vm10, %v1462_v43, %v1463_v42 }
  0x7c   : > { %v1466_v37 = vpop.permute.xlu2 %1465 }
  0x7d   : > { %v1468_v44 = vunpack.i.h.bf16 %v1466_v37  ;;  %v1467_v45 = vunpack.i.l.bf16 %v1466_v37 }
  0x7f   : > { %v405_v56 = vsel %vm243_vm9, %v1467_v45, %v1468_v44  ;;  %v406_v58 = vsel %vm243_vm9, %v1468_v44, %v1467_v45 }
  0x80   : > { %v407_v11 = vsel %vm1739_vm11, %v405_v56, %v400_v55  ;;  %v408_v12 = vsel %vm1743_vm12, %v406_v58, %v399_v57  ;;  %v409_v14 = vsel %vm1747_vm13, %v400_v55, %v405_v56 }
  0x8c   : > { %v1441_v5 = vpop.permute.xlu0 %1440 }
  0x8d   : > { %v1443_v15 = vunpack.i.h.bf16 %v1441_v5  ;;  %v1442_v16 = vunpack.i.l.bf16 %v1441_v5 }
  0x8f   : > { %v210_v24 = vsel %vm208_vm2, %v1443_v15, %v1442_v16  ;;  %v209_v26 = vsel %vm208_vm2, %v1442_v16, %v1443_v15  ;;  %v410_v15 = vsel %vm1751_vm14, %v399_v57, %v406_v58 }
  0x94   : > { %v1446_v17 = vpop.permute.xlu0 %1445 }
  0x95   : > { %v1448_v20 = vunpack.i.h.bf16 %v1446_v17  ;;  %v1447_v21 = vunpack.i.l.bf16 %v1446_v17 }
  0x97   : > { %v216_v25 = vsel %vm215_vm3, %v1447_v21, %v1448_v20  ;;  %v217_v27 = vsel %vm215_vm3, %v1448_v20, %v1447_v21 }
  0x98   : > { %v224_v28 = vsel %vm1689_vm4, %v216_v25, %v210_v24  ;;  %v225_v29 = vsel %vm1693_vm5, %v217_v27, %v209_v26  ;;  %v1720_v30 = vsel %vm1697_vm6, %v210_v24, %v216_v25  ;;  %v1724_v31 = vsel %vm1701_vm7, %v209_v26, %v217_v27 }
  0x99   : > { %280 = vmatpush.msra.mxu0 %v224_v28  ;;  %300 = vmatpush.msra.mxu1 %v225_v29  ;;  %v1469_v32 = vpack.i.bf16 %v1724_v31, %v1720_v30  ;;  %v1449_v33 = vpack.i.bf16 %v225_v29, %v224_v28  ;;  %v1344_v28 = vld [vmem:[%s2007_s1 + $0x18] sm:$0xff]  ;;  %v1347_v29 = vld [vmem:[%s2007_s1 + $0x20] sm:$0xff] }
  0x9a   : > { %1337 = vmatmul.msk.f32.vlgmr.msra.gmra.mxu0 %vm261_vm8, %v1336_v34  ;;  %1338 = vmatmul.msk.f32.vlgmr.msra.gmra.mxu1 %vm261_vm8, %v1336_v34  ;;  %v1350_v34 = vld [vmem:[%s2007_s1 + $0x28] sm:$0xff] }
  0x9b   : > { %1470 = vrot.lane.b32.xlu0 %v1469_v32, %s1590_s12  ;;  %1450 = vrot.lane.b32.xlu1 %v1449_v33, %s1590_s12 }
  0xa3   : > { %1455 = vrot.lane.b32.xlu1 %v1449_v33, %s1591_s13 }
  0xab   : > { %1475 = vrot.lane.b32.xlu1 %v1469_v32, %s1591_s13 }
 0x10d   : > { %v1451_v36 = vpop.permute.xlu1 %1450  ;;  %v1471_v59 = vpop.permute.xlu0 %1470 }
 0x10e   : > { %v1453_v46 = vunpack.i.h.bf16 %v1451_v36  ;;  %v1452_v47 = vunpack.i.l.bf16 %v1451_v36  ;;  %v1473_v8 = vunpack.i.h.bf16 %v1471_v59  ;;  %v1472_v9 = vunpack.i.l.bf16 %v1471_v59 }
 0x110   : > { %v238_v60 = vsel %vm236_vm10, %v1453_v46, %v1452_v47  ;;  %v237_v62 = vsel %vm236_vm10, %v1452_v47, %v1453_v46  ;;  %v557_v20 = vsel %vm236_vm10, %v1473_v8, %v1472_v9  ;;  %v556_v24 = vsel %vm236_vm10, %v1472_v9, %v1473_v8 }
 0x115   : > { %v1456_v48 = vpop.permute.xlu1 %1455 }
 0x116   : > { %v1458_v51 = vunpack.i.h.bf16 %v1456_v48  ;;  %v1457_v52 = vunpack.i.l.bf16 %v1456_v48 }
 0x117   : > { %v282_v36 = vpop.f32.mrf.mxu0  ;;  %v302_v37 = vpop.f32.mrf.mxu1 }
 0x118   : > { %v244_v61 = vsel %vm243_vm9, %v1457_v52, %v1458_v51  ;;  %v245_v63 = vsel %vm243_vm9, %v1458_v51, %v1457_v52 }
 0x119   : > { %v250_v2 = vsel %vm1739_vm11, %v244_v61, %v238_v60  ;;  %v251_v3 = vsel %vm1743_vm12, %v245_v63, %v237_v62  ;;  %v256_v4 = vsel %vm1747_vm13, %v238_v60, %v244_v61  ;;  %v257_v5 = vsel %vm1751_vm14, %v237_v62, %v245_v63 }
 0x11a   : > { %323 = vmatpush.msra.mxu2 %v250_v2  ;;  %343 = vmatpush.msra.mxu3 %v251_v3 }
 0x11b   : > { %368 = vmatpush.msrb.mxu0 %v256_v4  ;;  %388 = vmatpush.msrb.mxu1 %v257_v5 }
 0x11c   : > { %1339 = vmatmul.msk.f32.vlgmr.msra.gmra.mxu2 %vm261_vm8, %v258_v6  ;;  %1340 = vmatmul.msk.f32.vlgmr.msra.gmra.mxu3 %vm261_vm8, %v258_v6 }
 0x11d   : > { %1342 = vmatmul.msk.f32.vlgmr.msrb.gmra.mxu0 %vm261_vm8, %v1341_v7  ;;  %1343 = vmatmul.msk.f32.vlgmr.msrb.gmra.mxu1 %vm261_vm8, %v1341_v7  ;;  %v1476_v13 = vpop.permute.xlu1 %1475 }
 0x11e   : > { %431 = vmatpush.msrb.mxu2 %v407_v11  ;;  %451 = vmatpush.msrb.mxu3 %v408_v12  ;;  %v1478_v16 = vunpack.i.h.bf16 %v1476_v13  ;;  %v1477_v17 = vunpack.i.l.bf16 %v1476_v13 }
 0x11f   : > { %478 = vmatpush.msra.mxu0 %v1670_v0  ;;  %498 = vmatpush.msra.mxu1 %v1672_v1 }
 0x120   : > { %525 = vmatpush.msra.mxu2 %v409_v14  ;;  %545 = vmatpush.msra.mxu3 %v410_v15  ;;  %v562_v21 = vsel %vm243_vm9, %v1477_v17, %v1478_v16  ;;  %v563_v25 = vsel %vm243_vm9, %v1478_v16, %v1477_v17 }
 0x121   : > { %v564_v26 = vsel %vm1739_vm11, %v562_v21, %v557_v20  ;;  %v565_v27 = vsel %vm1743_vm12, %v563_v25, %v556_v24  ;;  %v566_v32 = vsel %vm1747_vm13, %v557_v20, %v562_v21  ;;  %v567_v33 = vsel %vm1751_vm14, %v556_v24, %v563_v25 }
 0x122   : > { %588 = vmatpush.msrb.mxu0 %v564_v26  ;;  %608 = vmatpush.msrb.mxu1 %v565_v27 }
 0x124   : > { %1345 = vmatmul.msk.f32.vlgmr.msrb.gmra.mxu2 %vm261_vm8, %v1344_v28  ;;  %1346 = vmatmul.msk.f32.vlgmr.msrb.gmra.mxu3 %vm261_vm8, %v1344_v28 }
 0x125   : > { %1348 = vmatmul.msk.f32.vlgmr.msra.gmra.mxu0 %vm261_vm8, %v1347_v29  ;;  %1349 = vmatmul.msk.f32.vlgmr.msra.gmra.mxu1 %vm261_vm8, %v1347_v29 }
 0x126   : > { %635 = vmatpush.msrb.mxu2 %v1720_v30  ;;  %655 = vmatpush.msrb.mxu3 %v1724_v31  ;;  %v1356_v30 = vld [vmem:[%s2007_s1 + $0x38] sm:$0xff]  ;;  %v1359_v31 = vld [vmem:[%s2007_s1 + $0x40] sm:$0xff] }
 0x127   : > { %682 = vmatpush.msra.mxu0 %v566_v32  ;;  %702 = vmatpush.msra.mxu1 %v567_v33 }
 0x12c   : > { %1351 = vmatmul.msk.f32.vlgmr.msra.gmra.mxu2 %vm261_vm8, %v1350_v34  ;;  %1352 = vmatmul.msk.f32.vlgmr.msra.gmra.mxu3 %vm261_vm8, %v1350_v34 }
 0x12d   : > { %1354 = vmatmul.msk.f32.vlgmr.msrb.gmra.mxu0 %vm261_vm8, %v1353_v35  ;;  %1355 = vmatmul.msk.f32.vlgmr.msrb.gmra.mxu1 %vm261_vm8, %v1353_v35 }
 0x134   : > { %1357 = vmatmul.msk.f32.vlgmr.msrb.gmra.mxu2 %vm261_vm8, %v1356_v30  ;;  %1358 = vmatmul.msk.f32.vlgmr.msrb.gmra.mxu3 %vm261_vm8, %v1356_v30 }
 0x135   : > { %1360 = vmatmul.msk.f32.vlgmr.msra.gmra.mxu0 %vm261_vm8, %v1359_v31  ;;  %1361 = vmatmul.msk.f32.vlgmr.msra.gmra.mxu1 %vm261_vm8, %v1359_v31 }
 0x19a   : > { %v370_v38 = vpop.f32.mrf.mxu0  ;;  %v390_v39 = vpop.f32.mrf.mxu1 }
 0x19f   : > { %v325_v40 = vpop.f32.mrf.mxu2  ;;  %v345_v41 = vpop.f32.mrf.mxu3 }
 0x1a0   : > { %v326_v44 = vadd.f32 %v325_v40, %v282_v36  ;;  %v346_v45 = vadd.f32 %v345_v41, %v302_v37 }
 0x1a2   : > { %v480_v42 = vpop.f32.mrf.mxu0  ;;  %v500_v43 = vpop.f32.mrf.mxu1  ;;  %v393_v48 = vadd.f32 %v370_v38, %v326_v44  ;;  %v394_v51 = vadd.f32 %v390_v39, %v346_v45 }
 0x1a7   : > { %v433_v46 = vpop.f32.mrf.mxu2  ;;  %v453_v47 = vpop.f32.mrf.mxu3 }
 0x1a8   : > { %v456_v52 = vadd.f32 %v433_v46, %v393_v48  ;;  %v457_v55 = vadd.f32 %v453_v47, %v394_v51 }
 0x1aa   : > { %v590_v56 = vpop.f32.mrf.mxu0  ;;  %v610_v57 = vpop.f32.mrf.mxu1  ;;  %v503_v60 = vadd.f32 %v480_v42, %v456_v52  ;;  %v504_v61 = vadd.f32 %v500_v43, %v457_v55 }
 0x1af   : > { %v527_v58 = vpop.f32.mrf.mxu2  ;;  %v547_v59 = vpop.f32.mrf.mxu3 }
 0x1b0   : > { %v550_v62 = vadd.f32 %v527_v58, %v503_v60  ;;  %v551_v63 = vadd.f32 %v547_v59, %v504_v61 }
 0x1b2   : > { %v613_v2 = vadd.f32 %v590_v56, %v550_v62  ;;  %v614_v3 = vadd.f32 %v610_v57, %v551_v63  ;;  %v684_v4 = vpop.f32.mrf.mxu0  ;;  %v704_v5 = vpop.f32.mrf.mxu1 }
 0x1b7   : > { %v637_v6 = vpop.f32.mrf.mxu2  ;;  %v657_v7 = vpop.f32.mrf.mxu3 }
 0x1b8   : > { %v660_v8 = vadd.f32 %v637_v6, %v613_v2  ;;  %v661_v9 = vadd.f32 %v657_v7, %v614_v3 }
 0x1ba   : > { %v707_v11 = vadd.f32 %v684_v4, %v660_v8  ;;  %v708_v12 = vadd.f32 %v704_v5, %v661_v9 }
 0x1bc   : > { %v709_v13 = vadd.f32 %v708_v12, %v707_v11  ;;  %v712_v14 = vmul.f32 %v707_v11, %v707_v11  ;;  %v713_v15 = vmul.f32 %v708_v12, %v708_v12 }
 0x1be   : > { %710 = vadd.xlane.f32.xlu2 %v709_v13  ;;  %v714_v16 = vadd.f32 %v713_v15, %v712_v14  ;;  %v771_v14 = vld [vmem:[%s2008_s2] sm:$0xff]  ;;  %v1367_v15 = vld [vmem:[%s2008_s2 + $0x10] sm:$0xff] }
 0x1c0   : > { %715 = vadd.xlane.f32.xlu0 %v714_v16 }
 0x231   : > { %v711_v17 = vpop.xlane.xlu2 %710 }
 0x232   : > { %v717_v20 = vmul.f32 0.00390625, %v711_v17 }
 0x233   : > { %v716_v21 = vpop.xlane.xlu0 %715 }
 0x234   : > { %v718_v24 = vmul.f32 0.00390625, %v716_v21  ;;  %v719_v25 = vmul.f32 %v717_v20, %v717_v20  ;;  %v722_v31 = vsub.f32 %v707_v11, %v717_v20  ;;  %v723_v36 = vsub.f32 %v708_v12, %v717_v20 }
 0x236   : > { %v720_v26 = vsub.f32 %v718_v24, %v719_v25 }
 0x238   : > { %v721_v27 = vmax.f32 %v720_v26, 0.0 }
 0x23a   : > { %v724_v28 = vadd.f32 1e-05, %v721_v27 }
 0x23c   : > { %1519 = vrsqrt.f32 %v724_v28  ;;  %vm731_vm0 = vweird.f32 %v724_v28 }
 0x242   : > { %v1520_v29 = vpop.eup %1519 }
 0x243   : > { %v726_v32 = vmul.f32 %v1520_v29, %v724_v28  ;;  %vm732_vm15 = vweird.f32 %v1520_v29 }
 0x244   : > { %vm733_vm1 = vmor %vm731_vm0, %vm732_vm15 }
 0x245   : > { %v727_v33 = vmul.f32 %v1520_v29, %v726_v32 }
 0x247   : > { %v728_v34 = vmul.f32 0.5, %v727_v33 }
 0x249   : > { %v729_v35 = vsub.f32 1.5, %v728_v34  ;;  %v1370_v34 = vld [vmem:[%s2008_s2 + $0x18] sm:$0xff] }
 0x24b   : > { %v730_v30 = vmul.f32 %v1520_v29, %v729_v35 }
 0x24d   : > { %v734_v37 = vsel %vm733_vm1, %v1520_v29, %v730_v30 }
 0x24e   : > { %v735_v38 = vmul.f32 %v734_v37, %v722_v31  ;;  %v736_v39 = vmul.f32 %v734_v37, %v723_v36  ;;  %v1373_v31 = vld [vmem:[%s2008_s2 + $0x20] sm:$0xff] }
 0x250   : > { %v737_v40 = vmax.f32 %v735_v38, 0.0  ;;  %v738_v41 = vmax.f32 %v736_v39, 0.0 }
 0x252   : > { %v1504_v42 = vpack.i.bf16 %v738_v41, %v737_v40 }
 0x254   : > { %1505 = vrot.lane.b32.xlu2 %v1504_v42, %s1591_s13  ;;  %1480 = vrot.lane.b32.xlu1 %v1504_v42, %s1587_s6 }
 0x25c   : > { %1485 = vrot.lane.b32.xlu1 %v1504_v42, %s1588_s7  ;;  %s188_s7 = sand.u32 1, %s1577_s16  }
 0x2ae   : > { %v1506_v8 = vpop.permute.xlu2 %1505 }
 0x2af   : > { %v1508_v16 = vunpack.i.h.bf16 %v1506_v8  ;;  %v1507_v17 = vunpack.i.l.bf16 %v1506_v8 }
 0x2b1   : > { %v917_v26 = vsel %vm243_vm9, %v1507_v17, %v1508_v16  ;;  %v918_v28 = vsel %vm243_vm9, %v1508_v16, %v1507_v17 }
 0x2c6   : > { %v1481_v43 = vpop.permute.xlu1 %1480 }
 0x2c7   : > { %v1483_v44 = vunpack.i.h.bf16 %v1481_v43  ;;  %v1482_v45 = vunpack.i.l.bf16 %v1481_v43 }
 0x2c9   : > { %v744_v51 = vsel %vm208_vm2, %v1483_v44, %v1482_v45  ;;  %v743_v55 = vsel %vm208_vm2, %v1482_v45, %v1483_v44 }
 0x2ce   : > { %v1486_v46 = vpop.permute.xlu1 %1485 }
 0x2cf   : > { %v1488_v47 = vunpack.i.h.bf16 %v1486_v46  ;;  %v1487_v48 = vunpack.i.l.bf16 %v1486_v46 }
 0x2d1   : > { %v749_v52 = vsel %vm215_vm3, %v1487_v48, %v1488_v47  ;;  %v750_v56 = vsel %vm215_vm3, %v1488_v47, %v1487_v48  ;;  %v1376_v47 = vld [vmem:[%s2008_s2 + $0x28] sm:$0xff] }
 0x2d2   : > { %v751_v57 = vsel %vm1689_vm4, %v749_v52, %v744_v51  ;;  %v752_v58 = vsel %vm1693_vm5, %v750_v56, %v743_v55  ;;  %v1864_v59 = vsel %vm1697_vm6, %v744_v51, %v749_v52  ;;  %v1868_v60 = vsel %vm1701_vm7, %v743_v55, %v750_v56 }
 0x2d3   : > { %792 = vmatpush.msra.mxu2 %v751_v57  ;;  %812 = vmatpush.msra.mxu3 %v752_v58  ;;  %v1514_v61 = vpack.i.bf16 %v1868_v60, %v1864_v59  ;;  %v1489_v62 = vpack.i.bf16 %v752_v58, %v751_v57 }
 0x2d4   : > { %1363 = vmatmul.msk.f32.vlgmr.msra.gmra.mxu2 %vm261_vm8, %v1362_v18  ;;  %1364 = vmatmul.msk.f32.vlgmr.msra.gmra.mxu3 %vm261_vm8, %v1362_v18 }
 0x2d5   : > { %1515 = vrot.lane.b32.xlu0 %v1514_v61, %s1591_s13  ;;  %1490 = vrot.lane.b32.xlu1 %v1489_v62, %s1590_s12 }
 0x2dd   : > { %1495 = vrot.lane.b32.xlu1 %v1489_v62, %s1591_s13  ;;  %s1394_s13 = sshll.u32 %s1638_s19, 4  ;;  %s1254_s19 = scalar_lea.sflag [#allocation3], %s188_s7 }
 0x2de   : > { %s1265_s30 = scalar_lea.hbm %s2010_s4, %s1394_s13 }
 0x2df   : > { %s1269_s9 = sshll.u32 %s1265_s30, 4  ;;  %s1270_s9 = int_to_ptr.hbm [resolvable:$true] %s1269_s9 }
 0x2e0   : > { %s1537_s10 = sshra.s32 %s1270_s9, 4  ;;  %s1538_s10 = int_to_ptr.hbm [resolvable:$true] %s1537_s10 }
 0x2e1   : > { %s1539_s11 = scalar_lea.hbm %s1538_s10, 16  ;;  %p1544_p0 = scmp.lt.s32.totalorder %s1538_s10, %s2010_s4 }
 0x2e2   : > { %p1540_p11 = scmp.ne.s32.totalorder %s1538_s10, %s1539_s11  ;;  %p1545_p1 = scmp.lt.s32.totalorder %s1543_s22, %s1539_s11 }
 0x2e4   : > { %p1541_p12 = pnand %p1540_p11, %p1655_p5  ;;  %p1546_p2 = por %p1545_p1, %p1544_p0 }
 0x2e5   : > { %1500 = vrot.lane.b32.xlu1 %v1504_v42, %s1590_s12 }
 0x2e6   : > { %p1542_p13 = pneg %p1541_p12 }
 0x2e8   : > { %p1547_p3 = pnand %p1546_p2, %p1542_p13 }
 0x2ed   : > { %1510 = vrot.lane.b32.xlu1 %v1514_v61, %s1590_s12  ;;  %s1333_s12 = sshll.u32 %s188_s7, 4 }
 0x2ee   : > { %s190_s5 = scalar_lea.vmem [#allocation2], %s1333_s12 }
 0x2ef   : > { %s1267_s8 = sshll.u32 %s190_s5, 4  ;;  %s1268_s8 = int_to_ptr.vmem [resolvable:$true] %s1267_s8 }
 0x347   : > { %v1491_v19 = vpop.permute.xlu1 %1490  ;;  %v1516_v29 = vpop.permute.xlu0 %1515 }
 0x348   : > { %v1493_v22 = vunpack.i.h.bf16 %v1491_v19  ;;  %v1492_v23 = vunpack.i.l.bf16 %v1491_v19  ;;  %v1518_v36 = vunpack.i.h.bf16 %v1516_v29  ;;  %v1517_v37 = vunpack.i.l.bf16 %v1516_v29 }
 0x34a   : > { %v760_v4 = vsel %vm236_vm10, %v1493_v22, %v1492_v23  ;;  %v759_v6 = vsel %vm236_vm10, %v1492_v23, %v1493_v22  ;;  %v1075_v42 = vsel %vm243_vm9, %v1518_v36, %v1517_v37 }
 0x34f   : > { %v1496_v63 = vpop.permute.xlu1 %1495 }
 0x350   : > { %v1498_v2 = vunpack.i.h.bf16 %v1496_v63  ;;  %v1497_v3 = vunpack.i.l.bf16 %v1496_v63 }
 0x352   : > { %v765_v5 = vsel %vm243_vm9, %v1497_v3, %v1498_v2  ;;  %v766_v7 = vsel %vm243_vm9, %v1498_v2, %v1497_v3 }
 0x353   : > { %v767_v9 = vsel %vm1739_vm11, %v765_v5, %v760_v4  ;;  %v768_v11 = vsel %vm1743_vm12, %v766_v7, %v759_v6  ;;  %v769_v12 = vsel %vm1747_vm13, %v760_v4, %v765_v5  ;;  %v770_v13 = vsel %vm1751_vm14, %v759_v6, %v766_v7 }
 0x354   : > { %835 = vmatpush.msrb.mxu0 %v767_v9  ;;  %855 = vmatpush.msrb.mxu1 %v768_v11 }
 0x355   : > { %880 = vmatpush.msrb.mxu2 %v769_v12  ;;  %900 = vmatpush.msrb.mxu3 %v770_v13 }
 0x356   : > { %1365 = vmatmul.msk.f32.vlgmr.msrb.gmra.mxu0 %vm261_vm8, %v771_v14  ;;  %1366 = vmatmul.msk.f32.vlgmr.msrb.gmra.mxu1 %vm261_vm8, %v771_v14 }
 0x357   : > { %1368 = vmatmul.msk.f32.vlgmr.msrb.gmra.mxu2 %vm261_vm8, %v1367_v15  ;;  %1369 = vmatmul.msk.f32.vlgmr.msrb.gmra.mxu3 %vm261_vm8, %v1367_v15  ;;  %v1501_v20 = vpop.permute.xlu1 %1500  ;;  %v794_v53 = vpop.f32.mrf.mxu2 }
 0x358   : > { %990 = vmatpush.msra.mxu2 %v737_v40  ;;  %1010 = vmatpush.msra.mxu3 %v738_v41  ;;  %v1503_v21 = vunpack.i.h.bf16 %v1501_v20  ;;  %v1502_v24 = vunpack.i.l.bf16 %v1501_v20  ;;  %v1074_v41 = vsel %vm243_vm9, %v1517_v37, %v1518_v36  ;;  %v814_v54 = vpop.f32.mrf.mxu3 }
 0x35a   : > { %v912_v25 = vsel %vm236_vm10, %v1503_v21, %v1502_v24  ;;  %v911_v27 = vsel %vm236_vm10, %v1502_v24, %v1503_v21 }
 0x35b   : > { %v919_v32 = vsel %vm1739_vm11, %v917_v26, %v912_v25  ;;  %v920_v33 = vsel %vm1743_vm12, %v918_v28, %v911_v27  ;;  %v921_v35 = vsel %vm1747_vm13, %v912_v25, %v917_v26  ;;  %v922_v30 = vsel %vm1751_vm14, %v911_v27, %v918_v28 }
 0x35c   : > { %943 = vmatpush.msra.mxu0 %v919_v32  ;;  %963 = vmatpush.msra.mxu1 %v920_v33 }
 0x35e   : > { %1037 = vmatpush.msrb.mxu0 %v921_v35  ;;  %1057 = vmatpush.msrb.mxu1 %v922_v30 }
 0x35f   : > { %1371 = vmatmul.msk.f32.vlgmr.msra.gmra.mxu0 %vm261_vm8, %v1370_v34  ;;  %1372 = vmatmul.msk.f32.vlgmr.msra.gmra.mxu1 %vm261_vm8, %v1370_v34  ;;  %v1511_v38 = vpop.permute.xlu1 %1510 }
 0x360   : > { %1374 = vmatmul.msk.f32.vlgmr.msra.gmra.mxu2 %vm261_vm8, %v1373_v31  ;;  %1375 = vmatmul.msk.f32.vlgmr.msra.gmra.mxu3 %vm261_vm8, %v1373_v31  ;;  %v1513_v39 = vunpack.i.h.bf16 %v1511_v38  ;;  %v1512_v40 = vunpack.i.l.bf16 %v1511_v38 }
 0x361   : > { %1147 = vmatpush.msra.mxu0 %v1864_v59  ;;  %1167 = vmatpush.msra.mxu1 %v1868_v60 }
 0x362   : > { %v1069_v43 = vsel %vm236_vm10, %v1513_v39, %v1512_v40  ;;  %v1068_v44 = vsel %vm236_vm10, %v1512_v40, %v1513_v39 }
 0x363   : > { %v1076_v45 = vsel %vm1739_vm11, %v1074_v41, %v1069_v43  ;;  %v1077_v46 = vsel %vm1743_vm12, %v1075_v42, %v1068_v44  ;;  %v1078_v48 = vsel %vm1747_vm13, %v1069_v43, %v1074_v41  ;;  %v1079_v51 = vsel %vm1751_vm14, %v1068_v44, %v1075_v42 }
 0x364   : > { %1100 = vmatpush.msrb.mxu2 %v1076_v45  ;;  %1120 = vmatpush.msrb.mxu3 %v1077_v46 }
 0x366   : > { %1194 = vmatpush.msra.mxu2 %v1078_v48  ;;  %1214 = vmatpush.msra.mxu3 %v1079_v51 }
 0x367   : > { %1377 = vmatmul.msk.f32.vlgmr.msrb.gmra.mxu0 %vm261_vm8, %v1376_v47  ;;  %1378 = vmatmul.msk.f32.vlgmr.msrb.gmra.mxu1 %vm261_vm8, %v1376_v47 }
 0x368   : > { %1380 = vmatmul.msk.f32.vlgmr.msrb.gmra.mxu2 %vm261_vm8, %v1379_v10  ;;  %1381 = vmatmul.msk.f32.vlgmr.msrb.gmra.mxu3 %vm261_vm8, %v1379_v10 }
 0x36f   : > { %1383 = vmatmul.msk.f32.vlgmr.msra.gmra.mxu0 %vm261_vm8, %v1382_v49  ;;  %1384 = vmatmul.msk.f32.vlgmr.msra.gmra.mxu1 %vm261_vm8, %v1382_v49 }
 0x370   : > { %1386 = vmatmul.msk.f32.vlgmr.msra.gmra.mxu2 %vm261_vm8, %v1385_v50  ;;  %1387 = vmatmul.msk.f32.vlgmr.msra.gmra.mxu3 %vm261_vm8, %v1385_v50 }
 0x3d3   : > { %v837_v52 = vpop.f32.mrf.mxu0  ;;  %v857_v55 = vpop.f32.mrf.mxu1 }
 0x3d4   : > { %v838_v60 = vadd.f32 %v837_v52, %v794_v53  ;;  %v858_v61 = vadd.f32 %v857_v55, %v814_v54 }
 0x3da   : > { %v882_v56 = vpop.f32.mrf.mxu2  ;;  %v902_v57 = vpop.f32.mrf.mxu3 }
 0x3db   : > { %v905_v62 = vadd.f32 %v882_v56, %v838_v60  ;;  %v906_v18 = vadd.f32 %v902_v57, %v858_v61 }
 0x3dc   : > { %v945_v58 = vpop.f32.mrf.mxu0  ;;  %v965_v59 = vpop.f32.mrf.mxu1 }
 0x3dd   : > { %v968_v2 = vadd.f32 %v945_v58, %v905_v62  ;;  %v969_v3 = vadd.f32 %v965_v59, %v906_v18 }
 0x3e3   : > { %v992_v19 = vpop.f32.mrf.mxu2  ;;  %v1012_v22 = vpop.f32.mrf.mxu3 }
 0x3e4   : > { %v1039_v23 = vpop.f32.mrf.mxu0  ;;  %v1059_v63 = vpop.f32.mrf.mxu1  ;;  %v1015_v4 = vadd.f32 %v992_v19, %v968_v2  ;;  %v1016_v5 = vadd.f32 %v1012_v22, %v969_v3 }
 0x3e6   : > { %v1062_v8 = vadd.f32 %v1039_v23, %v1015_v4  ;;  %v1063_v9 = vadd.f32 %v1059_v63, %v1016_v5 }
 0x3eb   : > { %v1102_v6 = vpop.f32.mrf.mxu2  ;;  %v1122_v7 = vpop.f32.mrf.mxu3 }
 0x3ec   : > { %v1125_v11 = vadd.f32 %v1102_v6, %v1062_v8  ;;  %v1126_v12 = vadd.f32 %v1122_v7, %v1063_v9  ;;  %v1149_v13 = vpop.f32.mrf.mxu0  ;;  %v1169_v14 = vpop.f32.mrf.mxu1 }
 0x3ee   : > { %v1172_v15 = vadd.f32 %v1149_v13, %v1125_v11  ;;  %v1173_v16 = vadd.f32 %v1169_v14, %v1126_v12 }
 0x3f3   : > { %v1196_v17 = vpop.f32.mrf.mxu2  ;;  %v1216_v20 = vpop.f32.mrf.mxu3 }
 0x3f4   : > { %v1219_v21 = vadd.f32 %v1196_v17, %v1172_v15  ;;  %v1220_v24 = vadd.f32 %v1216_v20, %v1173_v16 }
 0x3f6   : > { %v1221_v25 = vadd.f32 %v1220_v24, %v1219_v21  ;;  %v1224_v26 = vmul.f32 %v1219_v21, %v1219_v21  ;;  %v1225_v27 = vmul.f32 %v1220_v24, %v1220_v24 }
 0x3f8   : > { %1222 = vadd.xlane.f32.xlu1 %v1221_v25  ;;  %v1226_v28 = vadd.f32 %v1225_v27, %v1224_v26 }
 0x3fa   : > { %1227 = vadd.xlane.f32.xlu2 %v1226_v28 }
 0x46b   : > { %v1223_v29 = vpop.xlane.xlu1 %1222 }
 0x46c   : > { %v1229_v32 = vmul.f32 0.00390625, %v1223_v29 }
 0x46d   : > { %v1228_v33 = vpop.xlane.xlu2 %1227 }
 0x46e   : > { %v1230_v34 = vmul.f32 0.00390625, %v1228_v33  ;;  %v1231_v35 = vmul.f32 %v1229_v32, %v1229_v32  ;;  %v1234_v43 = vsub.f32 %v1219_v21, %v1229_v32  ;;  %v1235_v44 = vsub.f32 %v1220_v24, %v1229_v32 }
 0x470   : > { %v1232_v30 = vsub.f32 %v1230_v34, %v1231_v35 }
 0x472   : > { %v1233_v31 = vmax.f32 %v1232_v30, 0.0 }
 0x474   : > { %v1236_v36 = vadd.f32 1e-05, %v1233_v31 }
 0x476   : > { %1521 = vrsqrt.f32 %v1236_v36  ;;  %vm1243_vm3 = vweird.f32 %v1236_v36 }
 0x47c   : > { %v1522_v37 = vpop.eup %1521 }
 0x47d   : > { %v1238_v38 = vmul.f32 %v1522_v37, %v1236_v36  ;;  %vm1244_vm2 = vweird.f32 %v1522_v37 }
 0x47e   : > { %vm1245_vm4 = vmor %vm1243_vm3, %vm1244_vm2 }
 0x47f   : > { %v1239_v39 = vmul.f32 %v1522_v37, %v1238_v38 }
 0x481   : > { %v1240_v40 = vmul.f32 0.5, %v1239_v39 }
 0x483   : > { %v1241_v41 = vsub.f32 1.5, %v1240_v40 }
 0x485   : > { %v1242_v42 = vmul.f32 %v1522_v37, %v1241_v41 }
 0x487   : > { %v1246_v45 = vsel %vm1245_vm4, %v1522_v37, %v1242_v42 }
 0x488   : > { %v1247_v46 = vmul.f32 %v1246_v45, %v1234_v43  ;;  %v1248_v47 = vmul.f32 %v1246_v45, %v1235_v44 }
 0x48a   : > { %v1249_v48 = vadd.f32 %v1247_v46, %v1670_v0  ;;  %v1250_v51 = vadd.f32 %v1248_v47, %v1672_v1 }
 0x48c   : > { %1251 = vst [vmem:[%s190_s5] sm:$0xff] %v1249_v48 }
 0x48d   : > { %1252 = vst [vmem:[%s190_s5 + $0x8] sm:$0xff] %v1250_v51 }
 0x48e   : > { %1550 = shalt.err (!%p1547_p3)
}
 0x48f   : > { %1395 = dma.vmem_to_hbm [thread:$0]  (%p1655_p5), %s1268_s8, 256, %s1270_s9, %s1254_s19  }
 0x490 PF: > { %p1401_p4 = scmp.ge.s32.totalorder %s1585_s18, 2  ;;  %s1281_s6 = sand.u32 1, %s1573_s15  }
 0x491   : > { %s1282_s7 = scalar_lea.sflag [#allocation3], %s1281_s6 }
 0x492   : > { %p1398_p7 = pnand %p1401_p4, %p1659_p6 }
 0x494   : > { %p1399_p8 = pneg %p1398_p7 }
 0x496   : > { %1568 = dma.done.wait (%p1399_p8), %s1282_s7, 256  }
 0x497   : > { %1570 = vsyncadd (%p1399_p8), %s1282_s7, 4294967040  ;;  %p14_p9 = scmp.ge.s32.totalorder %s1642_s21, 4   ;;  %s2029_s15 = smov %s1577_s16 }
 0x498   : > { %s2030_s16 = smov %s1581_s17  ;;  %s2031_s17 = smov %s1653_s24 }
 0x499   : > { %s2032_s18 = smov %s1642_s21  ;;  %16 = sbr.rel (!%p14_p9) target bundleno = 3 (0x3), region = 87 }
 0x49e   :  { %1288 = vsyncpa [#allocation3], 1 }
 0x49f   :  { %1290 = vsyncpa [#allocation3 + $0x1], 1 }

</bundles_post_ra>
